<compile_context>
chip_gen: v6e
topology: v6e:2x2x1
jax: 0.10.0
libtpu: 0.0.40
codegen_flags: <defaults>
</compile_context>

<pallas_src>
import functools

import numpy as np
import jax
import jax.numpy as jnp
from jax import lax
from jax.experimental import pallas as pl
from jax.experimental.pallas import tpu as pltpu

LOG10 = float(np.log(10.0))
LN_EPS = 1e-5
VMEM_LIMIT = 48 * 1024 * 1024       # <= v7x 64 MiB physical; fine on v5e/v6e
MAX_ROW_TILE = 1024                 # bf16 weights + Buffered(1) keep this in budget
GRU_CHUNK_BUDGET = 8 * 1024 * 1024  # VMEM budget for double-buffered GRU chunks


def _round_up(x, m):
    return ((x + m - 1) // m) * m


def _row_plan(n, max_tm=MAX_ROW_TILE):
    tm = min(max_tm, _round_up(n, 8))
    n_pad = _round_up(n, tm)
    return tm, n_pad, n_pad // tm


def _pad_rows(x, n_pad):
    n = x.shape[0]
    if n_pad == n:
        return x
    return jnp.pad(x, ((0, n_pad - n),) + ((0, 0),) * (x.ndim - 1))


def _wspec(a):
    # Loop-invariant weight: full block, constant index map, single buffer.
    zeros = (0,) * a.ndim
    return pl.BlockSpec(a.shape, lambda i, _z=zeros: _z,
                        pipeline_mode=pl.Buffered(1))


# ----------------------------------------------------------------------------
# Shared helper: 3 x (Linear -> LayerNorm -> ReLU)
#   w0     : (Fin, H)  loaded weight (f32 if Fin==1 else bf16)
#   w12_ref: (2, H, H) ref, bf16
#   v_ref  : (9, H)    ref, f32; rows = [b0,g0,be0, b1,g1,be1, b2,g2,be2]
# ----------------------------------------------------------------------------
def _mlp3(x, w0, w12_ref, v_ref):
    v = v_ref[...]

    def ln_relu(y, k):
        mu = jnp.mean(y, axis=-1, keepdims=True)
        var = jnp.mean(jnp.square(y - mu), axis=-1, keepdims=True)
        y = (y - mu) * lax.rsqrt(var + LN_EPS)
        y = y * v[3 * k + 1:3 * k + 2, :] + v[3 * k + 2:3 * k + 3, :]
        return jnp.maximum(y, 0.0)

    if w0.shape[0] == 1:
        # Fin == 1: K=1 matmul wastes the MXU; do a VPU broadcast mul-add.
        y = x * w0 + v[0:1, :]
    else:
        y = jnp.dot(x.astype(jnp.bfloat16), w0,
                    preferred_element_type=jnp.float32) + v[0:1, :]
    h = ln_relu(y, 0)
    for k in (1, 2):
        y = jnp.dot(h.astype(jnp.bfloat16), w12_ref[k - 1],
                    preferred_element_type=jnp.float32) + v[3 * k:3 * k + 1, :]
        h = ln_relu(y, k)
    return h


# ----------------------------------------------------------------------------
# Kernel A: fused input MLPs + hoisted GRU input projection (no concat)
#   o = hz @ Wi_z + hf @ Wi_f + hl @ Wi_l + (bi + bhr|bhz folded)
# ----------------------------------------------------------------------------
def fused_input_kernel(f0_ref, lo_ref, z_ref,
                       wz0, wz12, vz,
                       wf0, wf12, vf,
                       wl0, wl12, vl,
                       wi_ref, bi_ref,
                       o_ref):
    hz = _mlp3(z_ref[...], wz0[...], wz12, vz)
    acc = jnp.dot(hz.astype(jnp.bfloat16), wi_ref[0],
                  preferred_element_type=jnp.float32)
    hf = _mlp3(f0_ref[...], wf0[...], wf12, vf)
    acc = acc + jnp.dot(hf.astype(jnp.bfloat16), wi_ref[1],
                        preferred_element_type=jnp.float32)
    hl = _mlp3(lo_ref[...], wl0[...], wl12, vl)
    acc = acc + jnp.dot(hl.astype(jnp.bfloat16), wi_ref[2],
                        preferred_element_type=jnp.float32)
    o_ref[...] = (acc + bi_ref[...]).astype(o_ref.dtype)


def fused_input_forward(f0, lo, z, p):
    n = f0.shape[0]
    cz = z.shape[1]
    h3 = p["gru_in"][0].shape[-1]
    tm, n_pad, grid = _row_plan(n)

    f0p = _pad_rows(f0, n_pad)
    lop = _pad_rows(lo, n_pad)
    zp = _pad_rows(z, n_pad)

    def rowspec(f):
        return pl.BlockSpec((tm, f), lambda i: (i, 0))

    wz0, wz12, vz = p["z_mlp"]
    wf0, wf12, vf = p["f0_mlp"]
    wl0, wl12, vl = p["lo_mlp"]
    wi, bi = p["gru_in"]
    weights = [wz0, wz12, vz, wf0, wf12, vf, wl0, wl12, vl, wi, bi]

    out = pl.pallas_call(
        fused_input_kernel,
        out_shape=jax.ShapeDtypeStruct((n_pad, h3), jnp.bfloat16),
        grid=(grid,),
        in_specs=[rowspec(1), rowspec(1), rowspec(cz)]
                 + [_wspec(w) for w in weights],
        out_specs=rowspec(h3),
        compiler_params=pltpu.CompilerParams(
            dimension_semantics=("parallel",),
            vmem_limit_bytes=VMEM_LIMIT),
    )(f0p, lop, zp, *weights)
    return out[:n]


# ----------------------------------------------------------------------------
# Kernel B: GRU recurrence (PyTorch nn.GRU semantics).
# x is time-major (T_pad, B_pad, 3H) bf16, already contains Wi x + bi (+bhr/bhz).
# One fused (H,3H) bf16 recurrent matmul per step; gates = [r | z | n].
# ----------------------------------------------------------------------------
def gru_kernel(x_ref, h0_ref, wh_ref, bhn_ref, y_ref, ht_ref, h_scr,
               *, t_valid, unroll):
    @pl.when(pl.program_id(0) == 0)
    def _():
        h_scr[...] = h0_ref[...]

    wh = wh_ref[...]                          # (H, 3H) bf16
    bhn = bhn_ref[...]                        # (1, H)  f32
    hdim = h_scr.shape[-1]
    tc = x_ref.shape[0]
    base = pl.program_id(0) * tc

    def step(t, h):
        xg = x_ref[t].astype(jnp.float32)                              # (B, 3H)
        hg = jnp.dot(h.astype(jnp.bfloat16), wh,
                     preferred_element_type=jnp.float32)               # (B, 3H)
        r = jax.nn.sigmoid(xg[:, :hdim] + hg[:, :hdim])
        zg = jax.nn.sigmoid(xg[:, hdim:2 * hdim] + hg[:, hdim:2 * hdim])
        ng = jnp.tanh(xg[:, 2 * hdim:] + r * (hg[:, 2 * hdim:] + bhn))
        h_new = (1.0 - zg) * ng + zg * h
        y_ref[t] = h_new.astype(y_ref.dtype)
        if t_valid is not None:
            # Padded tail steps must not advance the carried state.
            h_new = jnp.where(base + t < t_valid, h_new, h)
        return h_new

    h_scr[...] = lax.fori_loop(0, tc, step, h_scr[...], unroll=unroll)

    @pl.when(pl.program_id(0) == pl.num_programs(0) - 1)
    def _():
        ht_ref[...] = h_scr[...]


def _gru_chunk(t, b, h3, h):
    # Double-buffered bf16 x-chunk + y-chunk bytes per timestep.
    per_t = 2 * (b * h3 * 2) + 2 * (b * h * 2)
    tc = GRU_CHUNK_BUDGET // max(per_t, 1)
    return int(max(8, min(256, tc, max(t, 1))))


def gru_forward(x_tbf, h0, p):
    t, b, h3 = x_tbf.shape
    h = h0.shape[-1]
    wh, bhn = p
    tc = _gru_chunk(t, b, h3, h)
    grid = pl.cdiv(t, tc)
    t_pad = grid * tc
    if t_pad != t:
        x_tbf = jnp.pad(x_tbf, ((0, t_pad - t), (0, 0), (0, 0)))
    t_valid = t if t_pad != t else None
    unroll = True if tc <= 16 else 8
    kernel = functools.partial(gru_kernel, t_valid=t_valid, unroll=unroll)

    y, ht = pl.pallas_call(
        kernel,
        out_shape=(jax.ShapeDtypeStruct((t_pad, b, h), jnp.bfloat16),
                   jax.ShapeDtypeStruct((b, h), jnp.float32)),
        grid=(grid,),
        in_specs=[pl.BlockSpec((tc, b, h3), lambda i: (i, 0, 0)),
                  _wspec(h0),
                  _wspec(wh),
                  _wspec(bhn)],
        out_specs=(pl.BlockSpec((tc, b, h), lambda i: (i, 0, 0)),
                   pl.BlockSpec((b, h), lambda i: (0, 0))),
        scratch_shapes=[pltpu.VMEM((b, h), jnp.float32)],
        compiler_params=pltpu.CompilerParams(
            dimension_semantics=("arbitrary",),
            vmem_limit_bytes=VMEM_LIMIT),
    )(x_tbf, h0, wh, bhn)
    return y[:t], ht


# ----------------------------------------------------------------------------
# Kernel C: fused fi_MLP + all dense heads (single 128-lane-padded output slab)
# Columns: [amp(1) | alpha(P) | filt(F) | reverb(2) | zero pad]
# ----------------------------------------------------------------------------
def fused_heads_kernel(y_ref, wfi0, wfi12, vfi, wh_ref, bh_ref, o_ref,
                       *, n_sig, a_lo, a_hi):
    h = _mlp3(y_ref[...], wfi0[...], wfi12, vfi)
    raw = jnp.dot(h.astype(jnp.bfloat16), wh_ref[...],
                  preferred_element_type=jnp.float32) + bh_ref[...]
    # mod_sigmoid(v) = 2*sigmoid(v)**ln(10) + 1e-7 == 2*exp(-ln(10)*softplus(-v)) + 1e-7
    g = 2.0 * jnp.exp(-LOG10 * jax.nn.softplus(-raw)) + 1e-7
    cols = lax.broadcasted_iota(jnp.int32, raw.shape, 1)
    sig_mask = cols < n_sig
    alpha_mask = (cols >= a_lo) & (cols < a_hi)
    asum = jnp.sum(jnp.where(alpha_mask, g, 0.0), axis=-1, keepdims=True)
    inv = pl.reciprocal(asum, approx=True)
    inv = inv * (2.0 - asum * inv)          # one Newton step -> ~f32 accuracy
    out = jnp.where(sig_mask, g, raw)       # reverb / pad stay raw
    out = jnp.where(alpha_mask, g * inv, out)
    o_ref[...] = out


def fused_heads_forward(y2d, p):
    n, hdim = y2d.shape
    wfi0, wfi12, vfi = p["fi_mlp"]
    wh, bh = p["heads"]
    dpad = wh.shape[1]
    _, npart, fdim = p["dims"]
    tm, n_pad, grid = _row_plan(n)
    y2d = _pad_rows(y2d, n_pad)
    kernel = functools.partial(fused_heads_kernel,
                               n_sig=1 + npart + fdim, a_lo=1, a_hi=1 + npart)
    weights = [wfi0, wfi12, vfi, wh, bh]
    out = pl.pallas_call(
        kernel,
        out_shape=jax.ShapeDtypeStruct((n_pad, dpad), jnp.float32),
        grid=(grid,),
        in_specs=[pl.BlockSpec((tm, hdim), lambda i: (i, 0))]
                 + [_wspec(w) for w in weights],
        out_specs=pl.BlockSpec((tm, dpad), lambda i: (i, 0)),
        compiler_params=pltpu.CompilerParams(
            dimension_semantics=("parallel",),
            vmem_limit_bytes=VMEM_LIMIT),
    )(y2d, *weights)
    return out[:n]


# ----------------------------------------------------------------------------
# Parameter construction (deterministic, PyTorch-style uniform init) + packing
# ----------------------------------------------------------------------------
def _uniform(key, shape, fan_in):
    bound = 1.0 / np.sqrt(max(fan_in, 1))
    return jax.random.uniform(key, shape, jnp.float32, -bound, bound)


def init_mlp(key, in_size, out_size, loop=3):
    params = []
    sizes = [in_size] + [out_size] * loop
    for i in range(loop):
        key, kw, kb = jax.random.split(key, 3)
        fin, fout = sizes[i], sizes[i + 1]
        w = _uniform(kw, (fin, fout), fin)
        b = _uniform(kb, (fout,), fin)
        g = jnp.ones((fout,), jnp.float32)
        be = jnp.zeros((fout,), jnp.float32)
        params.append((w, b, g, be))
    return params


def pack_mlp(layers):
    (w0, b0, g0, be0), (w1, b1, g1, be1), (w2, b2, g2, be2) = layers
    # First-layer weight stays f32 when Fin==1 (VPU broadcast path); else bf16.
    w0p = w0 if w0.shape[0] == 1 else w0.astype(jnp.bfloat16)
    w12 = jnp.stack([w1, w2]).astype(jnp.bfloat16)                # (2, H, H)
    vecs = jnp.stack([b0, g0, be0, b1, g1, be1, b2, g2, be2])     # (9, H) f32
    return w0p, w12, vecs


def init_gru(key, input_size, hidden_size):
    ks = jax.random.split(key, 12)
    fan = hidden_size
    wir = _uniform(ks[0], (input_size, hidden_size), fan)
    wiz = _uniform(ks[1], (input_size, hidden_size), fan)
    win_ = _uniform(ks[2], (input_size, hidden_size), fan)
    whr = _uniform(ks[3], (hidden_size, hidden_size), fan)
    whz = _uniform(ks[4], (hidden_size, hidden_size), fan)
    whn = _uniform(ks[5], (hidden_size, hidden_size), fan)
    bir = _uniform(ks[6], (hidden_size,), fan)
    biz = _uniform(ks[7], (hidden_size,), fan)
    bin_ = _uniform(ks[8], (hidden_size,), fan)
    bhr = _uniform(ks[9], (hidden_size,), fan)
    bhz = _uniform(ks[10], (hidden_size,), fan)
    bhn = _uniform(ks[11], (hidden_size,), fan)
    return (wir, wiz, win_, whr, whz, whn, bir, biz, bin_, bhr, bhz, bhn)


def init_dense(key, in_size, out_size):
    kw, kb = jax.random.split(key)
    return (_uniform(kw, (in_size, out_size), in_size),
            _uniform(kb, (out_size,), in_size))


def init_decoder(key, hidden_size, n_partial, filter_size, conv_out_size):
    ks = jax.random.split(key, 9)
    h = hidden_size
    filt_dim = filter_size // 2 + 1

    f0_mlp = init_mlp(ks[0], 1, h)
    lo_mlp = init_mlp(ks[1], 1, h)
    z_mlp = init_mlp(ks[2], conv_out_size, h)
    gru = init_gru(ks[3], 3 * h, h)
    fi_mlp = init_mlp(ks[4], h, h)
    wa, ba = init_dense(ks[5], h, 1)
    wal, bal = init_dense(ks[6], h, n_partial)
    wf, bf = init_dense(ks[7], h, filt_dim)
    wr, br = init_dense(ks[8], h, 2)

    (wir, wiz, win_, whr, whz, whn, bir, biz, bin_, bhr, bhz, bhn) = gru
    # Input-feature order matches torch.cat([z, f0, lo], -1):
    #   rows [0:H) -> z, [H:2H) -> f0, [2H:3H) -> lo of each (3H, H) weight.
    wi_cat = jnp.concatenate([wir, wiz, win_], axis=1)            # (3H, 3H)
    wi_stack = jnp.stack([wi_cat[:h], wi_cat[h:2 * h], wi_cat[2 * h:]])  # (3,H,3H)
    # Fold bhr/bhz into the input-side bias; bhn must stay inside r*(Whn h + bhn).
    bi_cat = jnp.concatenate([bir + bhr, biz + bhz, bin_]).reshape(1, -1)  # (1,3H)
    wh_cat = jnp.concatenate([whr, whz, whn], axis=1)             # (H, 3H)

    d_raw = 1 + n_partial + filt_dim + 2
    d_pad = _round_up(d_raw, 128)
    w_heads = jnp.concatenate([wa, wal, wf, wr], axis=1)
    w_heads = jnp.pad(w_heads, ((0, 0), (0, d_pad - d_raw)))
    b_heads = jnp.pad(jnp.concatenate([ba, bal, bf, br]),
                      (0, d_pad - d_raw)).reshape(1, -1)

    return {
        "f0_mlp": pack_mlp(f0_mlp),
        "lo_mlp": pack_mlp(lo_mlp),
        "z_mlp": pack_mlp(z_mlp),
        "gru_in": (wi_stack.astype(jnp.bfloat16), bi_cat),
        "gru_rec": (wh_cat.astype(jnp.bfloat16), bhn.reshape(1, -1)),
        "fi_mlp": pack_mlp(fi_mlp),
        "heads": (w_heads.astype(jnp.bfloat16), b_heads),
        "dims": (h, n_partial, filt_dim),
    }


# ----------------------------------------------------------------------------
# Decoder forward
# ----------------------------------------------------------------------------
def decoder_forward(params, z, f0, lo, hx=None):
    b, t, cz = z.shape
    h, npart, fdim = params["dims"]
    n = b * t

    # Time-major flatten so kernel A directly produces the (T*B, 3H) GRU input
    # in time-major order (no transpose of the large intermediate).
    f0_t = jnp.transpose(f0, (1, 0, 2)).reshape(n, 1)
    lo_t = jnp.transpose(lo, (1, 0, 2)).reshape(n, 1)
    z_t = jnp.transpose(z, (1, 0, 2)).reshape(n, cz)

    x_proj = fused_input_forward(f0_t, lo_t, z_t, params)     # (T*B, 3H) bf16
    x_proj = x_proj.reshape(t, b, 3 * h)

    # Pad batch to the 8-row sublane count for the recurrence.
    b_pad = max(8, _round_up(b, 8))
    if b_pad != b:
        x_proj = jnp.pad(x_proj, ((0, 0), (0, b_pad - b), (0, 0)))
    if hx is None:
        h0 = jnp.zeros((b_pad, h), jnp.float32)
    else:
        h0 = hx[0].astype(jnp.float32)
        if b_pad != b:
            h0 = jnp.pad(h0, ((0, b_pad - b), (0, 0)))

    y_tbf, h_t = gru_forward(x_proj, h0, params["gru_rec"])   # (T,Bp,H) bf16, (Bp,H) f32
    if b_pad != b:
        y_tbf = y_tbf[:, :b]
        h_t = h_t[:b]

    # Heads consume time-major rows directly; only the small 128-column slab
    # is transposed afterwards (HBM-traffic win vs. transposing the H-wide y).
    y2d = y_tbf.reshape(n, h)
    slab = fused_heads_forward(y2d, params)                   # (n, 128) f32
    slab = jnp.transpose(slab.reshape(t, b, -1), (1, 0, 2))   # (B, T, 128)

    amp = slab[..., 0:1]
    alpha = slab[..., 1:1 + npart]
    filt = slab[..., 1 + npart:1 + npart + fdim]
    reverb = slab[..., 1 + npart + fdim:1 + npart + fdim + 2]
    return amp, alpha, filt, h_t[None], reverb                # h like nn.GRU (1,B,H)


if __name__ == "__main__":
    B, T = 2, 8
    hidden_size = 32
    n_partial = 8
    filter_size = 64          # -> filter_size // 2 + 1 = 33
    conv_out_size = 16        # stand-in for ddsp.conv_out_size

    key = jax.random.PRNGKey(0)
    kp, kz, kf, kl = jax.random.split(key, 4)

    params = init_decoder(kp, hidden_size, n_partial, filter_size, conv_out_size)

    z = jax.random.normal(kz, (B, T, conv_out_size), jnp.float32)
    f0 = jax.random.normal(kf, (B, T, 1), jnp.float32)
    lo = jax.random.normal(kl, (B, T, 1), jnp.float32)

    amp, alpha, filt, h, reverb = decoder_forward(params, z, f0, lo)
    jax.block_until_ready((amp, alpha, filt, h, reverb))

    assert amp.shape == (B, T, 1)
    assert alpha.shape == (B, T, n_partial)
    assert filt.shape == (B, T, filter_size // 2 + 1)
    assert h.shape == (1, B, hidden_size)
    assert reverb.shape == (B, T, 2)
    assert np.allclose(np.asarray(jnp.sum(alpha, -1)), 1.0, atol=1e-4)
    assert np.all(np.isfinite(np.asarray(amp)))
    assert np.all(np.isfinite(np.asarray(filt)))
    assert np.all(np.isfinite(np.asarray(reverb)))
    assert np.all(np.isfinite(np.asarray(h)))

    print("KERNEL_OK")
</pallas_src>

<mosaic_0001>
module attributes {stable_mosaic.version = 11 : i64} {
  func.func @fused_input_kernel(%arg0: i32, %arg1: memref<16x1xf32, #tpu.memory_space<vmem>>, %arg2: memref<16x1xf32, #tpu.memory_space<vmem>>, %arg3: memref<16x16xf32, #tpu.memory_space<vmem>>, %arg4: memref<16x32xbf16, #tpu.memory_space<vmem>>, %arg5: memref<2x32x32xbf16, #tpu.memory_space<vmem>>, %arg6: memref<9x32xf32, #tpu.memory_space<vmem>>, %arg7: memref<1x32xf32, #tpu.memory_space<vmem>>, %arg8: memref<2x32x32xbf16, #tpu.memory_space<vmem>>, %arg9: memref<9x32xf32, #tpu.memory_space<vmem>>, %arg10: memref<1x32xf32, #tpu.memory_space<vmem>>, %arg11: memref<2x32x32xbf16, #tpu.memory_space<vmem>>, %arg12: memref<9x32xf32, #tpu.memory_space<vmem>>, %arg13: memref<3x32x96xbf16, #tpu.memory_space<vmem>>, %arg14: memref<1x96xf32, #tpu.memory_space<vmem>>, %arg15: memref<16x96xbf16, #tpu.memory_space<vmem>>) attributes {dimension_semantics = [#tpu.dimension_semantics<parallel>], iteration_bounds = array<i64: 1>, scalar_prefetch = 0 : i64, scratch_operands = 0 : i64, tpu.core_type = #tpu.core_type<tc>, window_params = [{transform_indices = @transform_0, window_bounds = array<i64: 16, 1>}, {transform_indices = @transform_1, window_bounds = array<i64: 16, 1>}, {transform_indices = @transform_2, window_bounds = array<i64: 16, 16>}, {pipeline_mode = #tpu.pipeline_mode<synchronous>, transform_indices = @transform_3, window_bounds = array<i64: 16, 32>}, {pipeline_mode = #tpu.pipeline_mode<synchronous>, transform_indices = @transform_4, window_bounds = array<i64: 2, 32, 32>}, {pipeline_mode = #tpu.pipeline_mode<synchronous>, transform_indices = @transform_5, window_bounds = array<i64: 9, 32>}, {pipeline_mode = #tpu.pipeline_mode<synchronous>, transform_indices = @transform_6, window_bounds = array<i64: 1, 32>}, {pipeline_mode = #tpu.pipeline_mode<synchronous>, transform_indices = @transform_7, window_bounds = array<i64: 2, 32, 32>}, {pipeline_mode = #tpu.pipeline_mode<synchronous>, transform_indices = @transform_8, window_bounds = array<i64: 9, 32>}, {pipeline_mode = #tpu.pipeline_mode<synchronous>, transform_indices = @transform_9, window_bounds = array<i64: 1, 32>}, {pipeline_mode = #tpu.pipeline_mode<synchronous>, transform_indices = @transform_10, window_bounds = array<i64: 2, 32, 32>}, {pipeline_mode = #tpu.pipeline_mode<synchronous>, transform_indices = @transform_11, window_bounds = array<i64: 9, 32>}, {pipeline_mode = #tpu.pipeline_mode<synchronous>, transform_indices = @transform_12, window_bounds = array<i64: 3, 32, 96>}, {pipeline_mode = #tpu.pipeline_mode<synchronous>, transform_indices = @transform_13, window_bounds = array<i64: 1, 96>}, {transform_indices = @transform_14, window_bounds = array<i64: 16, 96>}]} {
    %c0 = arith.constant 0 : index
    %c0_0 = arith.constant 0 : index
    %0 = vector.load %arg3[%c0, %c0_0] : memref<16x16xf32, #tpu.memory_space<vmem>>, vector<16x16xf32>
    %c0_1 = arith.constant 0 : index
    %c0_2 = arith.constant 0 : index
    %1 = vector.load %arg4[%c0_1, %c0_2] : memref<16x32xbf16, #tpu.memory_space<vmem>>, vector<16x32xbf16>
    %c0_3 = arith.constant 0 : index
    %c0_4 = arith.constant 0 : index
    %2 = vector.load %arg6[%c0_3, %c0_4] : memref<9x32xf32, #tpu.memory_space<vmem>>, vector<9x32xf32>
    %3 = arith.truncf %0 : vector<16x16xf32> to vector<16x16xbf16>
    %cst = arith.constant dense<0.000000e+00> : vector<16x32xf32>
    %4 = tpu.matmul %3, %1, %cst {dimension_numbers = #tpu.dot_dimension_numbers<[1], [0], [0], [1], [0, 0, 1, 1], [], []>} : vector<16x16xbf16>, vector<16x32xbf16>, vector<16x32xf32> -> vector<16x32xf32>
    %5 = vector.extract_strided_slice %2 {offsets = [0, 0], sizes = [1, 32], strides = [1, 1]} : vector<9x32xf32> to vector<1x32xf32>
    %6 = vector.broadcast %5 : vector<1x32xf32> to vector<16x32xf32>
    %7 = arith.addf %4, %6 : vector<16x32xf32>
    %cst_5 = arith.constant dense<0.000000e+00> : vector<16xf32>
    %8 = vector.multi_reduction <add>, %7, %cst_5 [1] : vector<16x32xf32> to vector<16xf32>
    %9 = vector.shape_cast %8 : vector<16xf32> to vector<16x1xf32>
    %cst_6 = arith.constant 3.200000e+01 : f32
    %10 = vector.broadcast %cst_6 : f32 to vector<16x1xf32>
    %11 = arith.divf %9, %10 : vector<16x1xf32>
    %12 = vector.broadcast %11 : vector<16x1xf32> to vector<16x32xf32>
    %13 = arith.subf %7, %12 : vector<16x32xf32>
    %14 = arith.mulf %13, %13 : vector<16x32xf32>
    %cst_7 = arith.constant dense<0.000000e+00> : vector<16xf32>
    %15 = vector.multi_reduction <add>, %14, %cst_7 [1] : vector<16x32xf32> to vector<16xf32>
    %16 = vector.shape_cast %15 : vector<16xf32> to vector<16x1xf32>
    %cst_8 = arith.constant 3.200000e+01 : f32
    %17 = vector.broadcast %cst_8 : f32 to vector<16x1xf32>
    %18 = arith.divf %16, %17 : vector<16x1xf32>
    %19 = vector.broadcast %11 : vector<16x1xf32> to vector<16x32xf32>
    %20 = arith.subf %7, %19 : vector<16x32xf32>
    %cst_9 = arith.constant 9.99999974E-6 : f32
    %21 = vector.broadcast %cst_9 : f32 to vector<16x1xf32>
    %22 = arith.addf %18, %21 : vector<16x1xf32>
    %23 = math.rsqrt %22 : vector<16x1xf32>
    %24 = vector.broadcast %23 : vector<16x1xf32> to vector<16x32xf32>
    %25 = arith.mulf %20, %24 : vector<16x32xf32>
    %26 = vector.extract_strided_slice %2 {offsets = [1, 0], sizes = [1, 32], strides = [1, 1]} : vector<9x32xf32> to vector<1x32xf32>
    %27 = vector.broadcast %26 : vector<1x32xf32> to vector<16x32xf32>
    %28 = arith.mulf %25, %27 : vector<16x32xf32>
    %29 = vector.extract_strided_slice %2 {offsets = [2, 0], sizes = [1, 32], strides = [1, 1]} : vector<9x32xf32> to vector<1x32xf32>
    %30 = vector.broadcast %29 : vector<1x32xf32> to vector<16x32xf32>
    %31 = arith.addf %28, %30 : vector<16x32xf32>
    %cst_10 = arith.constant 0.000000e+00 : f32
    %32 = vector.broadcast %cst_10 : f32 to vector<16x32xf32>
    %33 = arith.maximumf %31, %32 : vector<16x32xf32>
    %34 = arith.truncf %33 : vector<16x32xf32> to vector<16x32xbf16>
    %c0_11 = arith.constant 0 : index
    %c0_12 = arith.constant 0 : index
    %c0_13 = arith.constant 0 : index
    %35 = vector.load %arg5[%c0_11, %c0_12, %c0_13] : memref<2x32x32xbf16, #tpu.memory_space<vmem>>, vector<1x32x32xbf16>
    %36 = vector.shape_cast %35 : vector<1x32x32xbf16> to vector<32x32xbf16>
    %cst_14 = arith.constant dense<0.000000e+00> : vector<16x32xf32>
    %37 = tpu.matmul %34, %36, %cst_14 {dimension_numbers = #tpu.dot_dimension_numbers<[1], [0], [0], [1], [0, 0, 1, 1], [], []>} : vector<16x32xbf16>, vector<32x32xbf16>, vector<16x32xf32> -> vector<16x32xf32>
    %38 = vector.extract_strided_slice %2 {offsets = [3, 0], sizes = [1, 32], strides = [1, 1]} : vector<9x32xf32> to vector<1x32xf32>
    %39 = vector.broadcast %38 : vector<1x32xf32> to vector<16x32xf32>
    %40 = arith.addf %37, %39 : vector<16x32xf32>
    %cst_15 = arith.constant dense<0.000000e+00> : vector<16xf32>
    %41 = vector.multi_reduction <add>, %40, %cst_15 [1] : vector<16x32xf32> to vector<16xf32>
    %42 = vector.shape_cast %41 : vector<16xf32> to vector<16x1xf32>
    %cst_16 = arith.constant 3.200000e+01 : f32
    %43 = vector.broadcast %cst_16 : f32 to vector<16x1xf32>
    %44 = arith.divf %42, %43 : vector<16x1xf32>
    %45 = vector.broadcast %44 : vector<16x1xf32> to vector<16x32xf32>
    %46 = arith.subf %40, %45 : vector<16x32xf32>
    %47 = arith.mulf %46, %46 : vector<16x32xf32>
    %cst_17 = arith.constant dense<0.000000e+00> : vector<16xf32>
    %48 = vector.multi_reduction <add>, %47, %cst_17 [1] : vector<16x32xf32> to vector<16xf32>
    %49 = vector.shape_cast %48 : vector<16xf32> to vector<16x1xf32>
    %cst_18 = arith.constant 3.200000e+01 : f32
    %50 = vector.broadcast %cst_18 : f32 to vector<16x1xf32>
    %51 = arith.divf %49, %50 : vector<16x1xf32>
    %52 = vector.broadcast %44 : vector<16x1xf32> to vector<16x32xf32>
    %53 = arith.subf %40, %52 : vector<16x32xf32>
    %cst_19 = arith.constant 9.99999974E-6 : f32
    %54 = vector.broadcast %cst_19 : f32 to vector<16x1xf32>
    %55 = arith.addf %51, %54 : vector<16x1xf32>
    %56 = math.rsqrt %55 : vector<16x1xf32>
    %57 = vector.broadcast %56 : vector<16x1xf32> to vector<16x32xf32>
    %58 = arith.mulf %53, %57 : vector<16x32xf32>
    %59 = vector.extract_strided_slice %2 {offsets = [4, 0], sizes = [1, 32], strides = [1, 1]} : vector<9x32xf32> to vector<1x32xf32>
    %60 = vector.broadcast %59 : vector<1x32xf32> to vector<16x32xf32>
    %61 = arith.mulf %58, %60 : vector<16x32xf32>
    %62 = vector.extract_strided_slice %2 {offsets = [5, 0], sizes = [1, 32], strides = [1, 1]} : vector<9x32xf32> to vector<1x32xf32>
    %63 = vector.broadcast %62 : vector<1x32xf32> to vector<16x32xf32>
    %64 = arith.addf %61, %63 : vector<16x32xf32>
    %cst_20 = arith.constant 0.000000e+00 : f32
    %65 = vector.broadcast %cst_20 : f32 to vector<16x32xf32>
    %66 = arith.maximumf %64, %65 : vector<16x32xf32>
    %67 = arith.truncf %66 : vector<16x32xf32> to vector<16x32xbf16>
    %c1 = arith.constant 1 : index
    %c0_21 = arith.constant 0 : index
    %c0_22 = arith.constant 0 : index
    %68 = vector.load %arg5[%c1, %c0_21, %c0_22] : memref<2x32x32xbf16, #tpu.memory_space<vmem>>, vector<1x32x32xbf16>
    %69 = vector.shape_cast %68 : vector<1x32x32xbf16> to vector<32x32xbf16>
    %cst_23 = arith.constant dense<0.000000e+00> : vector<16x32xf32>
    %70 = tpu.matmul %67, %69, %cst_23 {dimension_numbers = #tpu.dot_dimension_numbers<[1], [0], [0], [1], [0, 0, 1, 1], [], []>} : vector<16x32xbf16>, vector<32x32xbf16>, vector<16x32xf32> -> vector<16x32xf32>
    %71 = vector.extract_strided_slice %2 {offsets = [6, 0], sizes = [1, 32], strides = [1, 1]} : vector<9x32xf32> to vector<1x32xf32>
    %72 = vector.broadcast %71 : vector<1x32xf32> to vector<16x32xf32>
    %73 = arith.addf %70, %72 : vector<16x32xf32>
    %cst_24 = arith.constant dense<0.000000e+00> : vector<16xf32>
    %74 = vector.multi_reduction <add>, %73, %cst_24 [1] : vector<16x32xf32> to vector<16xf32>
    %75 = vector.shape_cast %74 : vector<16xf32> to vector<16x1xf32>
    %cst_25 = arith.constant 3.200000e+01 : f32
    %76 = vector.broadcast %cst_25 : f32 to vector<16x1xf32>
    %77 = arith.divf %75, %76 : vector<16x1xf32>
    %78 = vector.broadcast %77 : vector<16x1xf32> to vector<16x32xf32>
    %79 = arith.subf %73, %78 : vector<16x32xf32>
    %80 = arith.mulf %79, %79 : vector<16x32xf32>
    %cst_26 = arith.constant dense<0.000000e+00> : vector<16xf32>
    %81 = vector.multi_reduction <add>, %80, %cst_26 [1] : vector<16x32xf32> to vector<16xf32>
    %82 = vector.shape_cast %81 : vector<16xf32> to vector<16x1xf32>
    %cst_27 = arith.constant 3.200000e+01 : f32
    %83 = vector.broadcast %cst_27 : f32 to vector<16x1xf32>
    %84 = arith.divf %82, %83 : vector<16x1xf32>
    %85 = vector.broadcast %77 : vector<16x1xf32> to vector<16x32xf32>
    %86 = arith.subf %73, %85 : vector<16x32xf32>
    %cst_28 = arith.constant 9.99999974E-6 : f32
    %87 = vector.broadcast %cst_28 : f32 to vector<16x1xf32>
    %88 = arith.addf %84, %87 : vector<16x1xf32>
    %89 = math.rsqrt %88 : vector<16x1xf32>
    %90 = vector.broadcast %89 : vector<16x1xf32> to vector<16x32xf32>
    %91 = arith.mulf %86, %90 : vector<16x32xf32>
    %92 = vector.extract_strided_slice %2 {offsets = [7, 0], sizes = [1, 32], strides = [1, 1]} : vector<9x32xf32> to vector<1x32xf32>
    %93 = vector.broadcast %92 : vector<1x32xf32> to vector<16x32xf32>
    %94 = arith.mulf %91, %93 : vector<16x32xf32>
    %95 = vector.extract_strided_slice %2 {offsets = [8, 0], sizes = [1, 32], strides = [1, 1]} : vector<9x32xf32> to vector<1x32xf32>
    %96 = vector.broadcast %95 : vector<1x32xf32> to vector<16x32xf32>
    %97 = arith.addf %94, %96 : vector<16x32xf32>
    %cst_29 = arith.constant 0.000000e+00 : f32
    %98 = vector.broadcast %cst_29 : f32 to vector<16x32xf32>
    %99 = arith.maximumf %97, %98 : vector<16x32xf32>
    %100 = arith.truncf %99 : vector<16x32xf32> to vector<16x32xbf16>
    %c0_30 = arith.constant 0 : index
    %c0_31 = arith.constant 0 : index
    %c0_32 = arith.constant 0 : index
    %101 = vector.load %arg13[%c0_30, %c0_31, %c0_32] : memref<3x32x96xbf16, #tpu.memory_space<vmem>>, vector<1x32x96xbf16>
    %102 = vector.shape_cast %101 : vector<1x32x96xbf16> to vector<32x96xbf16>
    %cst_33 = arith.constant dense<0.000000e+00> : vector<16x96xf32>
    %103 = tpu.matmul %100, %102, %cst_33 {dimension_numbers = #tpu.dot_dimension_numbers<[1], [0], [0], [1], [0, 0, 1, 1], [], []>} : vector<16x32xbf16>, vector<32x96xbf16>, vector<16x96xf32> -> vector<16x96xf32>
    %c0_34 = arith.constant 0 : index
    %c0_35 = arith.constant 0 : index
    %104 = vector.load %arg1[%c0_34, %c0_35] : memref<16x1xf32, #tpu.memory_space<vmem>>, vector<16x1xf32>
    %c0_36 = arith.constant 0 : index
    %c0_37 = arith.constant 0 : index
    %105 = vector.load %arg7[%c0_36, %c0_37] : memref<1x32xf32, #tpu.memory_space<vmem>>, vector<1x32xf32>
    %c0_38 = arith.constant 0 : index
    %c0_39 = arith.constant 0 : index
    %106 = vector.load %arg9[%c0_38, %c0_39] : memref<9x32xf32, #tpu.memory_space<vmem>>, vector<9x32xf32>
    %107 = vector.broadcast %104 : vector<16x1xf32> to vector<16x32xf32>
    %108 = vector.broadcast %105 : vector<1x32xf32> to vector<16x32xf32>
    %109 = arith.mulf %107, %108 : vector<16x32xf32>
    %110 = vector.extract_strided_slice %106 {offsets = [0, 0], sizes = [1, 32], strides = [1, 1]} : vector<9x32xf32> to vector<1x32xf32>
    %111 = vector.broadcast %110 : vector<1x32xf32> to vector<16x32xf32>
    %112 = arith.addf %109, %111 : vector<16x32xf32>
    %cst_40 = arith.constant dense<0.000000e+00> : vector<16xf32>
    %113 = vector.multi_reduction <add>, %112, %cst_40 [1] : vector<16x32xf32> to vector<16xf32>
    %114 = vector.shape_cast %113 : vector<16xf32> to vector<16x1xf32>
    %cst_41 = arith.constant 3.200000e+01 : f32
    %115 = vector.broadcast %cst_41 : f32 to vector<16x1xf32>
    %116 = arith.divf %114, %115 : vector<16x1xf32>
    %117 = vector.broadcast %116 : vector<16x1xf32> to vector<16x32xf32>
    %118 = arith.subf %112, %117 : vector<16x32xf32>
    %119 = arith.mulf %118, %118 : vector<16x32xf32>
    %cst_42 = arith.constant dense<0.000000e+00> : vector<16xf32>
    %120 = vector.multi_reduction <add>, %119, %cst_42 [1] : vector<16x32xf32> to vector<16xf32>
    %121 = vector.shape_cast %120 : vector<16xf32> to vector<16x1xf32>
    %cst_43 = arith.constant 3.200000e+01 : f32
    %122 = vector.broadcast %cst_43 : f32 to vector<16x1xf32>
    %123 = arith.divf %121, %122 : vector<16x1xf32>
    %124 = vector.broadcast %116 : vector<16x1xf32> to vector<16x32xf32>
    %125 = arith.subf %112, %124 : vector<16x32xf32>
    %cst_44 = arith.constant 9.99999974E-6 : f32
    %126 = vector.broadcast %cst_44 : f32 to vector<16x1xf32>
    %127 = arith.addf %123, %126 : vector<16x1xf32>
    %128 = math.rsqrt %127 : vector<16x1xf32>
    %129 = vector.broadcast %128 : vector<16x1xf32> to vector<16x32xf32>
    %130 = arith.mulf %125, %129 : vector<16x32xf32>
    %131 = vector.extract_strided_slice %106 {offsets = [1, 0], sizes = [1, 32], strides = [1, 1]} : vector<9x32xf32> to vector<1x32xf32>
    %132 = vector.broadcast %131 : vector<1x32xf32> to vector<16x32xf32>
    %133 = arith.mulf %130, %132 : vector<16x32xf32>
    %134 = vector.extract_strided_slice %106 {offsets = [2, 0], sizes = [1, 32], strides = [1, 1]} : vector<9x32xf32> to vector<1x32xf32>
    %135 = vector.broadcast %134 : vector<1x32xf32> to vector<16x32xf32>
    %136 = arith.addf %133, %135 : vector<16x32xf32>
    %cst_45 = arith.constant 0.000000e+00 : f32
    %137 = vector.broadcast %cst_45 : f32 to vector<16x32xf32>
    %138 = arith.maximumf %136, %137 : vector<16x32xf32>
    %139 = arith.truncf %138 : vector<16x32xf32> to vector<16x32xbf16>
    %c0_46 = arith.constant 0 : index
    %c0_47 = arith.constant 0 : index
    %c0_48 = arith.constant 0 : index
    %140 = vector.load %arg8[%c0_46, %c0_47, %c0_48] : memref<2x32x32xbf16, #tpu.memory_space<vmem>>, vector<1x32x32xbf16>
    %141 = vector.shape_cast %140 : vector<1x32x32xbf16> to vector<32x32xbf16>
    %cst_49 = arith.constant dense<0.000000e+00> : vector<16x32xf32>
    %142 = tpu.matmul %139, %141, %cst_49 {dimension_numbers = #tpu.dot_dimension_numbers<[1], [0], [0], [1], [0, 0, 1, 1], [], []>} : vector<16x32xbf16>, vector<32x32xbf16>, vector<16x32xf32> -> vector<16x32xf32>
    %143 = vector.extract_strided_slice %106 {offsets = [3, 0], sizes = [1, 32], strides = [1, 1]} : vector<9x32xf32> to vector<1x32xf32>
    %144 = vector.broadcast %143 : vector<1x32xf32> to vector<16x32xf32>
    %145 = arith.addf %142, %144 : vector<16x32xf32>
    %cst_50 = arith.constant dense<0.000000e+00> : vector<16xf32>
    %146 = vector.multi_reduction <add>, %145, %cst_50 [1] : vector<16x32xf32> to vector<16xf32>
    %147 = vector.shape_cast %146 : vector<16xf32> to vector<16x1xf32>
    %cst_51 = arith.constant 3.200000e+01 : f32
    %148 = vector.broadcast %cst_51 : f32 to vector<16x1xf32>
    %149 = arith.divf %147, %148 : vector<16x1xf32>
    %150 = vector.broadcast %149 : vector<16x1xf32> to vector<16x32xf32>
    %151 = arith.subf %145, %150 : vector<16x32xf32>
    %152 = arith.mulf %151, %151 : vector<16x32xf32>
    %cst_52 = arith.constant dense<0.000000e+00> : vector<16xf32>
    %153 = vector.multi_reduction <add>, %152, %cst_52 [1] : vector<16x32xf32> to vector<16xf32>
    %154 = vector.shape_cast %153 : vector<16xf32> to vector<16x1xf32>
    %cst_53 = arith.constant 3.200000e+01 : f32
    %155 = vector.broadcast %cst_53 : f32 to vector<16x1xf32>
    %156 = arith.divf %154, %155 : vector<16x1xf32>
    %157 = vector.broadcast %149 : vector<16x1xf32> to vector<16x32xf32>
    %158 = arith.subf %145, %157 : vector<16x32xf32>
    %cst_54 = arith.constant 9.99999974E-6 : f32
    %159 = vector.broadcast %cst_54 : f32 to vector<16x1xf32>
    %160 = arith.addf %156, %159 : vector<16x1xf32>
    %161 = math.rsqrt %160 : vector<16x1xf32>
    %162 = vector.broadcast %161 : vector<16x1xf32> to vector<16x32xf32>
    %163 = arith.mulf %158, %162 : vector<16x32xf32>
    %164 = vector.extract_strided_slice %106 {offsets = [4, 0], sizes = [1, 32], strides = [1, 1]} : vector<9x32xf32> to vector<1x32xf32>
    %165 = vector.broadcast %164 : vector<1x32xf32> to vector<16x32xf32>
    %166 = arith.mulf %163, %165 : vector<16x32xf32>
    %167 = vector.extract_strided_slice %106 {offsets = [5, 0], sizes = [1, 32], strides = [1, 1]} : vector<9x32xf32> to vector<1x32xf32>
    %168 = vector.broadcast %167 : vector<1x32xf32> to vector<16x32xf32>
    %169 = arith.addf %166, %168 : vector<16x32xf32>
    %cst_55 = arith.constant 0.000000e+00 : f32
    %170 = vector.broadcast %cst_55 : f32 to vector<16x32xf32>
    %171 = arith.maximumf %169, %170 : vector<16x32xf32>
    %172 = arith.truncf %171 : vector<16x32xf32> to vector<16x32xbf16>
    %c1_56 = arith.constant 1 : index
    %c0_57 = arith.constant 0 : index
    %c0_58 = arith.constant 0 : index
    %173 = vector.load %arg8[%c1_56, %c0_57, %c0_58] : memref<2x32x32xbf16, #tpu.memory_space<vmem>>, vector<1x32x32xbf16>
    %174 = vector.shape_cast %173 : vector<1x32x32xbf16> to vector<32x32xbf16>
    %cst_59 = arith.constant dense<0.000000e+00> : vector<16x32xf32>
    %175 = tpu.matmul %172, %174, %cst_59 {dimension_numbers = #tpu.dot_dimension_numbers<[1], [0], [0], [1], [0, 0, 1, 1], [], []>} : vector<16x32xbf16>, vector<32x32xbf16>, vector<16x32xf32> -> vector<16x32xf32>
    %176 = vector.extract_strided_slice %106 {offsets = [6, 0], sizes = [1, 32], strides = [1, 1]} : vector<9x32xf32> to vector<1x32xf32>
    %177 = vector.broadcast %176 : vector<1x32xf32> to vector<16x32xf32>
    %178 = arith.addf %175, %177 : vector<16x32xf32>
    %cst_60 = arith.constant dense<0.000000e+00> : vector<16xf32>
    %179 = vector.multi_reduction <add>, %178, %cst_60 [1] : vector<16x32xf32> to vector<16xf32>
    %180 = vector.shape_cast %179 : vector<16xf32> to vector<16x1xf32>
    %cst_61 = arith.constant 3.200000e+01 : f32
    %181 = vector.broadcast %cst_61 : f32 to vector<16x1xf32>
    %182 = arith.divf %180, %181 : vector<16x1xf32>
    %183 = vector.broadcast %182 : vector<16x1xf32> to vector<16x32xf32>
    %184 = arith.subf %178, %183 : vector<16x32xf32>
    %185 = arith.mulf %184, %184 : vector<16x32xf32>
    %cst_62 = arith.constant dense<0.000000e+00> : vector<16xf32>
    %186 = vector.multi_reduction <add>, %185, %cst_62 [1] : vector<16x32xf32> to vector<16xf32>
    %187 = vector.shape_cast %186 : vector<16xf32> to vector<16x1xf32>
    %cst_63 = arith.constant 3.200000e+01 : f32
    %188 = vector.broadcast %cst_63 : f32 to vector<16x1xf32>
    %189 = arith.divf %187, %188 : vector<16x1xf32>
    %190 = vector.broadcast %182 : vector<16x1xf32> to vector<16x32xf32>
    %191 = arith.subf %178, %190 : vector<16x32xf32>
    %cst_64 = arith.constant 9.99999974E-6 : f32
    %192 = vector.broadcast %cst_64 : f32 to vector<16x1xf32>
    %193 = arith.addf %189, %192 : vector<16x1xf32>
    %194 = math.rsqrt %193 : vector<16x1xf32>
    %195 = vector.broadcast %194 : vector<16x1xf32> to vector<16x32xf32>
    %196 = arith.mulf %191, %195 : vector<16x32xf32>
    %197 = vector.extract_strided_slice %106 {offsets = [7, 0], sizes = [1, 32], strides = [1, 1]} : vector<9x32xf32> to vector<1x32xf32>
    %198 = vector.broadcast %197 : vector<1x32xf32> to vector<16x32xf32>
    %199 = arith.mulf %196, %198 : vector<16x32xf32>
    %200 = vector.extract_strided_slice %106 {offsets = [8, 0], sizes = [1, 32], strides = [1, 1]} : vector<9x32xf32> to vector<1x32xf32>
    %201 = vector.broadcast %200 : vector<1x32xf32> to vector<16x32xf32>
    %202 = arith.addf %199, %201 : vector<16x32xf32>
    %cst_65 = arith.constant 0.000000e+00 : f32
    %203 = vector.broadcast %cst_65 : f32 to vector<16x32xf32>
    %204 = arith.maximumf %202, %203 : vector<16x32xf32>
    %205 = arith.truncf %204 : vector<16x32xf32> to vector<16x32xbf16>
    %c1_66 = arith.constant 1 : index
    %c0_67 = arith.constant 0 : index
    %c0_68 = arith.constant 0 : index
    %206 = vector.load %arg13[%c1_66, %c0_67, %c0_68] : memref<3x32x96xbf16, #tpu.memory_space<vmem>>, vector<1x32x96xbf16>
    %207 = vector.shape_cast %206 : vector<1x32x96xbf16> to vector<32x96xbf16>
    %cst_69 = arith.constant dense<0.000000e+00> : vector<16x96xf32>
    %208 = tpu.matmul %205, %207, %cst_69 {dimension_numbers = #tpu.dot_dimension_numbers<[1], [0], [0], [1], [0, 0, 1, 1], [], []>} : vector<16x32xbf16>, vector<32x96xbf16>, vector<16x96xf32> -> vector<16x96xf32>
    %209 = arith.addf %103, %208 : vector<16x96xf32>
    %c0_70 = arith.constant 0 : index
    %c0_71 = arith.constant 0 : index
    %210 = vector.load %arg2[%c0_70, %c0_71] : memref<16x1xf32, #tpu.memory_space<vmem>>, vector<16x1xf32>
    %c0_72 = arith.constant 0 : index
    %c0_73 = arith.constant 0 : index
    %211 = vector.load %arg10[%c0_72, %c0_73] : memref<1x32xf32, #tpu.memory_space<vmem>>, vector<1x32xf32>
    %c0_74 = arith.constant 0 : index
    %c0_75 = arith.constant 0 : index
    %212 = vector.load %arg12[%c0_74, %c0_75] : memref<9x32xf32, #tpu.memory_space<vmem>>, vector<9x32xf32>
    %213 = vector.broadcast %210 : vector<16x1xf32> to vector<16x32xf32>
    %214 = vector.broadcast %211 : vector<1x32xf32> to vector<16x32xf32>
    %215 = arith.mulf %213, %214 : vector<16x32xf32>
    %216 = vector.extract_strided_slice %212 {offsets = [0, 0], sizes = [1, 32], strides = [1, 1]} : vector<9x32xf32> to vector<1x32xf32>
    %217 = vector.broadcast %216 : vector<1x32xf32> to vector<16x32xf32>
    %218 = arith.addf %215, %217 : vector<16x32xf32>
    %cst_76 = arith.constant dense<0.000000e+00> : vector<16xf32>
    %219 = vector.multi_reduction <add>, %218, %cst_76 [1] : vector<16x32xf32> to vector<16xf32>
    %220 = vector.shape_cast %219 : vector<16xf32> to vector<16x1xf32>
    %cst_77 = arith.constant 3.200000e+01 : f32
    %221 = vector.broadcast %cst_77 : f32 to vector<16x1xf32>
    %222 = arith.divf %220, %221 : vector<16x1xf32>
    %223 = vector.broadcast %222 : vector<16x1xf32> to vector<16x32xf32>
    %224 = arith.subf %218, %223 : vector<16x32xf32>
    %225 = arith.mulf %224, %224 : vector<16x32xf32>
    %cst_78 = arith.constant dense<0.000000e+00> : vector<16xf32>
    %226 = vector.multi_reduction <add>, %225, %cst_78 [1] : vector<16x32xf32> to vector<16xf32>
    %227 = vector.shape_cast %226 : vector<16xf32> to vector<16x1xf32>
    %cst_79 = arith.constant 3.200000e+01 : f32
    %228 = vector.broadcast %cst_79 : f32 to vector<16x1xf32>
    %229 = arith.divf %227, %228 : vector<16x1xf32>
    %230 = vector.broadcast %222 : vector<16x1xf32> to vector<16x32xf32>
    %231 = arith.subf %218, %230 : vector<16x32xf32>
    %cst_80 = arith.constant 9.99999974E-6 : f32
    %232 = vector.broadcast %cst_80 : f32 to vector<16x1xf32>
    %233 = arith.addf %229, %232 : vector<16x1xf32>
    %234 = math.rsqrt %233 : vector<16x1xf32>
    %235 = vector.broadcast %234 : vector<16x1xf32> to vector<16x32xf32>
    %236 = arith.mulf %231, %235 : vector<16x32xf32>
    %237 = vector.extract_strided_slice %212 {offsets = [1, 0], sizes = [1, 32], strides = [1, 1]} : vector<9x32xf32> to vector<1x32xf32>
    %238 = vector.broadcast %237 : vector<1x32xf32> to vector<16x32xf32>
    %239 = arith.mulf %236, %238 : vector<16x32xf32>
    %240 = vector.extract_strided_slice %212 {offsets = [2, 0], sizes = [1, 32], strides = [1, 1]} : vector<9x32xf32> to vector<1x32xf32>
    %241 = vector.broadcast %240 : vector<1x32xf32> to vector<16x32xf32>
    %242 = arith.addf %239, %241 : vector<16x32xf32>
    %cst_81 = arith.constant 0.000000e+00 : f32
    %243 = vector.broadcast %cst_81 : f32 to vector<16x32xf32>
    %244 = arith.maximumf %242, %243 : vector<16x32xf32>
    %245 = arith.truncf %244 : vector<16x32xf32> to vector<16x32xbf16>
    %c0_82 = arith.constant 0 : index
    %c0_83 = arith.constant 0 : index
    %c0_84 = arith.constant 0 : index
    %246 = vector.load %arg11[%c0_82, %c0_83, %c0_84] : memref<2x32x32xbf16, #tpu.memory_space<vmem>>, vector<1x32x32xbf16>
    %247 = vector.shape_cast %246 : vector<1x32x32xbf16> to vector<32x32xbf16>
    %cst_85 = arith.constant dense<0.000000e+00> : vector<16x32xf32>
    %248 = tpu.matmul %245, %247, %cst_85 {dimension_numbers = #tpu.dot_dimension_numbers<[1], [0], [0], [1], [0, 0, 1, 1], [], []>} : vector<16x32xbf16>, vector<32x32xbf16>, vector<16x32xf32> -> vector<16x32xf32>
    %249 = vector.extract_strided_slice %212 {offsets = [3, 0], sizes = [1, 32], strides = [1, 1]} : vector<9x32xf32> to vector<1x32xf32>
    %250 = vector.broadcast %249 : vector<1x32xf32> to vector<16x32xf32>
    %251 = arith.addf %248, %250 : vector<16x32xf32>
    %cst_86 = arith.constant dense<0.000000e+00> : vector<16xf32>
    %252 = vector.multi_reduction <add>, %251, %cst_86 [1] : vector<16x32xf32> to vector<16xf32>
    %253 = vector.shape_cast %252 : vector<16xf32> to vector<16x1xf32>
    %cst_87 = arith.constant 3.200000e+01 : f32
    %254 = vector.broadcast %cst_87 : f32 to vector<16x1xf32>
    %255 = arith.divf %253, %254 : vector<16x1xf32>
    %256 = vector.broadcast %255 : vector<16x1xf32> to vector<16x32xf32>
    %257 = arith.subf %251, %256 : vector<16x32xf32>
    %258 = arith.mulf %257, %257 : vector<16x32xf32>
    %cst_88 = arith.constant dense<0.000000e+00> : vector<16xf32>
    %259 = vector.multi_reduction <add>, %258, %cst_88 [1] : vector<16x32xf32> to vector<16xf32>
    %260 = vector.shape_cast %259 : vector<16xf32> to vector<16x1xf32>
    %cst_89 = arith.constant 3.200000e+01 : f32
    %261 = vector.broadcast %cst_89 : f32 to vector<16x1xf32>
    %262 = arith.divf %260, %261 : vector<16x1xf32>
    %263 = vector.broadcast %255 : vector<16x1xf32> to vector<16x32xf32>
    %264 = arith.subf %251, %263 : vector<16x32xf32>
    %cst_90 = arith.constant 9.99999974E-6 : f32
    %265 = vector.broadcast %cst_90 : f32 to vector<16x1xf32>
    %266 = arith.addf %262, %265 : vector<16x1xf32>
    %267 = math.rsqrt %266 : vector<16x1xf32>
    %268 = vector.broadcast %267 : vector<16x1xf32> to vector<16x32xf32>
    %269 = arith.mulf %264, %268 : vector<16x32xf32>
    %270 = vector.extract_strided_slice %212 {offsets = [4, 0], sizes = [1, 32], strides = [1, 1]} : vector<9x32xf32> to vector<1x32xf32>
    %271 = vector.broadcast %270 : vector<1x32xf32> to vector<16x32xf32>
    %272 = arith.mulf %269, %271 : vector<16x32xf32>
    %273 = vector.extract_strided_slice %212 {offsets = [5, 0], sizes = [1, 32], strides = [1, 1]} : vector<9x32xf32> to vector<1x32xf32>
    %274 = vector.broadcast %273 : vector<1x32xf32> to vector<16x32xf32>
    %275 = arith.addf %272, %274 : vector<16x32xf32>
    %cst_91 = arith.constant 0.000000e+00 : f32
    %276 = vector.broadcast %cst_91 : f32 to vector<16x32xf32>
    %277 = arith.maximumf %275, %276 : vector<16x32xf32>
    %278 = arith.truncf %277 : vector<16x32xf32> to vector<16x32xbf16>
    %c1_92 = arith.constant 1 : index
    %c0_93 = arith.constant 0 : index
    %c0_94 = arith.constant 0 : index
    %279 = vector.load %arg11[%c1_92, %c0_93, %c0_94] : memref<2x32x32xbf16, #tpu.memory_space<vmem>>, vector<1x32x32xbf16>
    %280 = vector.shape_cast %279 : vector<1x32x32xbf16> to vector<32x32xbf16>
    %cst_95 = arith.constant dense<0.000000e+00> : vector<16x32xf32>
    %281 = tpu.matmul %278, %280, %cst_95 {dimension_numbers = #tpu.dot_dimension_numbers<[1], [0], [0], [1], [0, 0, 1, 1], [], []>} : vector<16x32xbf16>, vector<32x32xbf16>, vector<16x32xf32> -> vector<16x32xf32>
    %282 = vector.extract_strided_slice %212 {offsets = [6, 0], sizes = [1, 32], strides = [1, 1]} : vector<9x32xf32> to vector<1x32xf32>
    %283 = vector.broadcast %282 : vector<1x32xf32> to vector<16x32xf32>
    %284 = arith.addf %281, %283 : vector<16x32xf32>
    %cst_96 = arith.constant dense<0.000000e+00> : vector<16xf32>
    %285 = vector.multi_reduction <add>, %284, %cst_96 [1] : vector<16x32xf32> to vector<16xf32>
    %286 = vector.shape_cast %285 : vector<16xf32> to vector<16x1xf32>
    %cst_97 = arith.constant 3.200000e+01 : f32
    %287 = vector.broadcast %cst_97 : f32 to vector<16x1xf32>
    %288 = arith.divf %286, %287 : vector<16x1xf32>
    %289 = vector.broadcast %288 : vector<16x1xf32> to vector<16x32xf32>
    %290 = arith.subf %284, %289 : vector<16x32xf32>
    %291 = arith.mulf %290, %290 : vector<16x32xf32>
    %cst_98 = arith.constant dense<0.000000e+00> : vector<16xf32>
    %292 = vector.multi_reduction <add>, %291, %cst_98 [1] : vector<16x32xf32> to vector<16xf32>
    %293 = vector.shape_cast %292 : vector<16xf32> to vector<16x1xf32>
    %cst_99 = arith.constant 3.200000e+01 : f32
    %294 = vector.broadcast %cst_99 : f32 to vector<16x1xf32>
    %295 = arith.divf %293, %294 : vector<16x1xf32>
    %296 = vector.broadcast %288 : vector<16x1xf32> to vector<16x32xf32>
    %297 = arith.subf %284, %296 : vector<16x32xf32>
    %cst_100 = arith.constant 9.99999974E-6 : f32
    %298 = vector.broadcast %cst_100 : f32 to vector<16x1xf32>
    %299 = arith.addf %295, %298 : vector<16x1xf32>
    %300 = math.rsqrt %299 : vector<16x1xf32>
    %301 = vector.broadcast %300 : vector<16x1xf32> to vector<16x32xf32>
    %302 = arith.mulf %297, %301 : vector<16x32xf32>
    %303 = vector.extract_strided_slice %212 {offsets = [7, 0], sizes = [1, 32], strides = [1, 1]} : vector<9x32xf32> to vector<1x32xf32>
    %304 = vector.broadcast %303 : vector<1x32xf32> to vector<16x32xf32>
    %305 = arith.mulf %302, %304 : vector<16x32xf32>
    %306 = vector.extract_strided_slice %212 {offsets = [8, 0], sizes = [1, 32], strides = [1, 1]} : vector<9x32xf32> to vector<1x32xf32>
    %307 = vector.broadcast %306 : vector<1x32xf32> to vector<16x32xf32>
    %308 = arith.addf %305, %307 : vector<16x32xf32>
    %cst_101 = arith.constant 0.000000e+00 : f32
    %309 = vector.broadcast %cst_101 : f32 to vector<16x32xf32>
    %310 = arith.maximumf %308, %309 : vector<16x32xf32>
    %311 = arith.truncf %310 : vector<16x32xf32> to vector<16x32xbf16>
    %c2 = arith.constant 2 : index
    %c0_102 = arith.constant 0 : index
    %c0_103 = arith.constant 0 : index
    %312 = vector.load %arg13[%c2, %c0_102, %c0_103] : memref<3x32x96xbf16, #tpu.memory_space<vmem>>, vector<1x32x96xbf16>
    %313 = vector.shape_cast %312 : vector<1x32x96xbf16> to vector<32x96xbf16>
    %cst_104 = arith.constant dense<0.000000e+00> : vector<16x96xf32>
    %314 = tpu.matmul %311, %313, %cst_104 {dimension_numbers = #tpu.dot_dimension_numbers<[1], [0], [0], [1], [0, 0, 1, 1], [], []>} : vector<16x32xbf16>, vector<32x96xbf16>, vector<16x96xf32> -> vector<16x96xf32>
    %315 = arith.addf %209, %314 : vector<16x96xf32>
    %c0_105 = arith.constant 0 : index
    %c0_106 = arith.constant 0 : index
    %316 = vector.load %arg14[%c0_105, %c0_106] : memref<1x96xf32, #tpu.memory_space<vmem>>, vector<1x96xf32>
    %317 = vector.broadcast %316 : vector<1x96xf32> to vector<16x96xf32>
    %318 = arith.addf %315, %317 : vector<16x96xf32>
    %319 = arith.truncf %318 : vector<16x96xf32> to vector<16x96xbf16>
    %c0_107 = arith.constant 0 : index
    %c0_108 = arith.constant 0 : index
    %320 = vector.load %arg15[%c0_107, %c0_108] : memref<16x96xbf16, #tpu.memory_space<vmem>>, vector<16x96xbf16>
    tpu.vector_store %arg15[%c0_107, %c0_108], %319 {strides = array<i32>} : memref<16x96xbf16, #tpu.memory_space<vmem>>, vector<16x96xbf16>,
    return
  }
  func.func @transform_0(%arg0: i32) -> (i32, i32) {
    %c0_i32 = arith.constant 0 : i32
    %c0_i32_0 = arith.constant 0 : i32
    return %arg0, %c0_i32 : i32, i32
  }
  func.func @transform_1(%arg0: i32) -> (i32, i32) {
    %c0_i32 = arith.constant 0 : i32
    %c0_i32_0 = arith.constant 0 : i32
    return %arg0, %c0_i32 : i32, i32
  }
  func.func @transform_2(%arg0: i32) -> (i32, i32) {
    %c0_i32 = arith.constant 0 : i32
    %c0_i32_0 = arith.constant 0 : i32
    return %arg0, %c0_i32 : i32, i32
  }
  func.func @transform_3(%arg0: i32) -> (i32, i32) {
    %c0_i32 = arith.constant 0 : i32
    %c0_i32_0 = arith.constant 0 : i32
    %c0_i32_1 = arith.constant 0 : i32
    return %c0_i32, %c0_i32_0 : i32, i32
  }
  func.func @transform_4(%arg0: i32) -> (i32, i32, i32) {
    %c0_i32 = arith.constant 0 : i32
    %c0_i32_0 = arith.constant 0 : i32
    %c0_i32_1 = arith.constant 0 : i32
    %c0_i32_2 = arith.constant 0 : i32
    return %c0_i32, %c0_i32_0, %c0_i32_1 : i32, i32, i32
  }
  func.func @transform_5(%arg0: i32) -> (i32, i32) {
    %c0_i32 = arith.constant 0 : i32
    %c0_i32_0 = arith.constant 0 : i32
    %c0_i32_1 = arith.constant 0 : i32
    return %c0_i32, %c0_i32_0 : i32, i32
  }
  func.func @transform_6(%arg0: i32) -> (i32, i32) {
    %c0_i32 = arith.constant 0 : i32
    %c0_i32_0 = arith.constant 0 : i32
    %c0_i32_1 = arith.constant 0 : i32
    return %c0_i32, %c0_i32_0 : i32, i32
  }
  func.func @transform_7(%arg0: i32) -> (i32, i32, i32) {
    %c0_i32 = arith.constant 0 : i32
    %c0_i32_0 = arith.constant 0 : i32
    %c0_i32_1 = arith.constant 0 : i32
    %c0_i32_2 = arith.constant 0 : i32
    return %c0_i32, %c0_i32_0, %c0_i32_1 : i32, i32, i32
  }
  func.func @transform_8(%arg0: i32) -> (i32, i32) {
    %c0_i32 = arith.constant 0 : i32
    %c0_i32_0 = arith.constant 0 : i32
    %c0_i32_1 = arith.constant 0 : i32
    return %c0_i32, %c0_i32_0 : i32, i32
  }
  func.func @transform_9(%arg0: i32) -> (i32, i32) {
    %c0_i32 = arith.constant 0 : i32
    %c0_i32_0 = arith.constant 0 : i32
    %c0_i32_1 = arith.constant 0 : i32
    return %c0_i32, %c0_i32_0 : i32, i32
  }
  func.func @transform_10(%arg0: i32) -> (i32, i32, i32) {
    %c0_i32 = arith.constant 0 : i32
    %c0_i32_0 = arith.constant 0 : i32
    %c0_i32_1 = arith.constant 0 : i32
    %c0_i32_2 = arith.constant 0 : i32
    return %c0_i32, %c0_i32_0, %c0_i32_1 : i32, i32, i32
  }
  func.func @transform_11(%arg0: i32) -> (i32, i32) {
    %c0_i32 = arith.constant 0 : i32
    %c0_i32_0 = arith.constant 0 : i32
    %c0_i32_1 = arith.constant 0 : i32
    return %c0_i32, %c0_i32_0 : i32, i32
  }
  func.func @transform_12(%arg0: i32) -> (i32, i32, i32) {
    %c0_i32 = arith.constant 0 : i32
    %c0_i32_0 = arith.constant 0 : i32
    %c0_i32_1 = arith.constant 0 : i32
    %c0_i32_2 = arith.constant 0 : i32
    return %c0_i32, %c0_i32_0, %c0_i32_1 : i32, i32, i32
  }
  func.func @transform_13(%arg0: i32) -> (i32, i32) {
    %c0_i32 = arith.constant 0 : i32
    %c0_i32_0 = arith.constant 0 : i32
    %c0_i32_1 = arith.constant 0 : i32
    return %c0_i32, %c0_i32_0 : i32, i32
  }
  func.func @transform_14(%arg0: i32) -> (i32, i32) {
    %c0_i32 = arith.constant 0 : i32
    %c0_i32_0 = arith.constant 0 : i32
    return %arg0, %c0_i32 : i32, i32
  }
}

</mosaic_0001>

<bundles_post_ra>
// kernel: tpu_custom_call.1
= control target key start
LH: loop header
LB: loop body
LE: loop exit
PB: predicated region body
PF: predicated region fallthrough
CT: control target
= control target key end

     0   :  { %19 = vsyncpa [#allocation3], 0  ;;  %s2042_s0 = inlined_call_operand.vmem [shape: f32[16,1], index: 0, kind: input, shape index: {}]   ;;  %s2043_s1 = inlined_call_operand.vmem [shape: f32[16,1], index: 1, kind: input, shape index: {}]   ;;  %s2044_s2 = inlined_call_operand.hbm [shape: f32[16,16], index: 2, kind: input, shape index: {}]   ;;  %s2045_s3 = inlined_call_operand.hbm [shape: bf16[16,32], index: 3, kind: input, shape index: {}]   ;;  %s2046_s4 = inlined_call_operand.hbm [shape: bf16[2,32,32], index: 4, kind: input, shape index: {}]   ;;  %s2047_s5 = inlined_call_operand.hbm [shape: f32[9,32], index: 5, kind: input, shape index: {}]   ;;  %s2048_s6 = inlined_call_operand.vmem [shape: f32[1,32], index: 6, kind: input, shape index: {}]   ;;  %s2049_s7 = inlined_call_operand.hbm [shape: bf16[2,32,32], index: 7, kind: input, shape index: {}]   ;;  %s2050_s8 = inlined_call_operand.hbm [shape: f32[9,32], index: 8, kind: input, shape index: {}]   ;;  %s2051_s9 = inlined_call_operand.vmem [shape: f32[1,32], index: 9, kind: input, shape index: {}]   ;;  %s2052_s10 = inlined_call_operand.hbm [shape: bf16[2,32,32], index: 10, kind: input, shape index: {}]   ;;  %s2053_s11 = inlined_call_operand.hbm [shape: f32[9,32], index: 11, kind: input, shape index: {}]   ;;  %s2054_s12 = inlined_call_operand.vmem [shape: bf16[3,32,96], index: 12, kind: input, shape index: {}]   ;;  %s2055_s13 = inlined_call_operand.vmem [shape: f32[1,96], index: 13, kind: input, shape index: {}]   ;;  %s2056_s14 = inlined_call_operand.hbm [shape: bf16[16,96], index: 14, kind: output, shape index: {}]  }
   0x1   :  { %20 = vsyncpa [#allocation6], 0 }
   0x2   :  { %21 = vsyncpa [#allocation9], 0 }
   0x3   :  { %22 = vsyncpa [#allocation12], 0 }
   0x4   :  { %23 = vsyncpa [#allocation15], 0 }
   0x5   :  { %24 = vsyncpa [#allocation4], 0  ;;  %s1680_s29 = smov [#allocation5]  }
   0x6   :  { %s46_s30 = sshll.u32 %s1680_s29, 4  ;;  %s47_s30 = int_to_ptr.vmem [resolvable:$true] %s46_s30 }
   0x7   :  { %s1496_s15 = scalar_lea.vmem %s47_s30, 128  ;;  %p1501_p1 = scmp.lt.s32.totalorder %s47_s30, %s47_s30 }
   0x8   :  { %p1497_p0 = scmp.ne.s32.totalorder %s47_s30, %s1496_s15  ;;  %p1502_p2 = scmp.lt.s32.totalorder %s1496_s15, %s1496_s15 }
   0xa   :  { %p1503_p3 = por %p1502_p2, %p1501_p1 }
   0xc   :  { %p1504_p4 = pnand %p1503_p3, %p1497_p0 }
   0xe   :  { %1507 = shalt.err (!%p1504_p4)
}
   0xf   :  { %s1681_s16 = smov 64   ;;  %s1682_s17 = smov 4  }
  0x10   :  { %52 = dma.hbm_to_vmem [thread:$0]  %s2045_s3, 128, %s47_s30, [#allocation6], %s1681_s16, %s1681_s16, %s1682_s17  }
  0x11   :  { %s1683_s20 = smov [#allocation8]   ;;  %s1684_s22 = smov [#allocation11]  }
  0x12   :  { %s70_s21 = sshll.u32 %s1683_s20, 4  ;;  %s96_s23 = sshll.u32 %s1684_s22, 4  ;;  %s71_s21 = int_to_ptr.vmem [resolvable:$true] %s70_s21  ;;  %s97_s23 = int_to_ptr.vmem [resolvable:$true] %s96_s23 }
  0x13   :  { %s1516_s24 = scalar_lea.vmem %s71_s21, 256  ;;  %p1521_p6 = scmp.lt.s32.totalorder %s71_s21, %s71_s21 }
  0x14   :  { %p1517_p5 = scmp.ne.s32.totalorder %s71_s21, %s1516_s24  ;;  %p1522_p7 = scmp.lt.s32.totalorder %s1516_s24, %s1516_s24 }
  0x16   :  { %p1523_p8 = por %p1522_p7, %p1521_p6 }
  0x18   :  { %p1524_p9 = pnand %p1523_p8, %p1517_p5 }
  0x1a   :  { %1527 = shalt.err (!%p1524_p9)
}
  0x1b   :  { %s1685_s25 = smov 128   ;;  %s1686_s26 = smov 8  }
  0x1c   :  { %76 = dma.hbm_to_vmem [thread:$0]  %s2047_s5, 256, %s71_s21, [#allocation9], %s1685_s25, %s1685_s25, %s1686_s26  }
  0x1d   :  { %s1536_s3 = scalar_lea.vmem %s97_s23, 256  ;;  %p1541_p11 = scmp.lt.s32.totalorder %s97_s23, %s97_s23 }
  0x1e   :  { %p1537_p10 = scmp.ne.s32.totalorder %s97_s23, %s1536_s3  ;;  %p1542_p12 = scmp.lt.s32.totalorder %s1536_s3, %s1536_s3 }
  0x20   :  { %p1543_p13 = por %p1542_p12, %p1541_p11 }
  0x22   :  { %p1544_p0 = pnand %p1543_p13, %p1537_p10 }
  0x24   :  { %1547 = shalt.err (!%p1544_p0)
}
  0x25   :  { %102 = dma.hbm_to_vmem [thread:$0]  %s2050_s8, 256, %s97_s23, [#allocation12], %s1685_s25, %s1685_s25, %s1686_s26  }
  0x26   :  { %s1687_s15 = smov [#allocation2]   ;;  %s1688_s19 = smov [#allocation7]  }
  0x27   :  { %s34_s18 = sshll.u32 %s1687_s15, 4  ;;  %s58_s5 = sshll.u32 %s1688_s19, 4  ;;  %s35_s18 = int_to_ptr.vmem [resolvable:$true] %s34_s18  ;;  %s59_s5 = int_to_ptr.vmem [resolvable:$true] %s58_s5 }
  0x28   :  { %s1556_s20 = scalar_lea.vmem %s35_s18, 256  ;;  %p1561_p2 = scmp.lt.s32.totalorder %s35_s18, %s35_s18 }
  0x29   :  { %p1557_p1 = scmp.ne.s32.totalorder %s35_s18, %s1556_s20  ;;  %p1562_p3 = scmp.lt.s32.totalorder %s1556_s20, %s1556_s20 }
  0x2b   :  { %p1563_p4 = por %p1562_p3, %p1561_p2 }
  0x2d   :  { %p1564_p5 = pnand %p1563_p4, %p1557_p1 }
  0x2f   :  { %1567 = shalt.err (!%p1564_p5)
}
  0x30   :  { %40 = dma.hbm_to_vmem [thread:$0]  %s2044_s2, 256, %s35_s18, [#allocation3], %s1685_s25, %s1685_s25, %s1686_s26  }
  0x31   :  { %s1576_s8 = scalar_lea.vmem %s59_s5, 512  ;;  %p1581_p7 = scmp.lt.s32.totalorder %s59_s5, %s59_s5 }
  0x32   :  { %p1577_p6 = scmp.ne.s32.totalorder %s59_s5, %s1576_s8  ;;  %p1582_p8 = scmp.lt.s32.totalorder %s1576_s8, %s1576_s8 }
  0x34   :  { %p1583_p9 = por %p1582_p8, %p1581_p7 }
  0x36   :  { %p1584_p10 = pnand %p1583_p9, %p1577_p6 }
  0x38   :  { %1587 = shalt.err (!%p1584_p10)
}
  0x39   :  { %64 = dma.hbm_to_vmem [thread:$0]  %s2046_s4, 512, %s59_s5, [#allocation6], %s1681_s16, %s1681_s16, %s1682_s17  }
  0x3a   :  { %s1689_s27 = smov [#allocation10]   ;;  %s1690_s3 = smov [#allocation13]  }
  0x3b   :  { %s84_s28 = sshll.u32 %s1689_s27, 4  ;;  %s110_s2 = sshll.u32 %s1690_s3, 4  ;;  %s85_s28 = int_to_ptr.vmem [resolvable:$true] %s84_s28  ;;  %s111_s2 = int_to_ptr.vmem [resolvable:$true] %s110_s2 }
  0x3c   :  { %s1596_s29 = scalar_lea.vmem %s85_s28, 512  ;;  %p1601_p12 = scmp.lt.s32.totalorder %s85_s28, %s85_s28 }
  0x3d   :  { %p1597_p11 = scmp.ne.s32.totalorder %s85_s28, %s1596_s29  ;;  %p1602_p13 = scmp.lt.s32.totalorder %s1596_s29, %s1596_s29 }
  0x3f   :  { %p1603_p0 = por %p1602_p13, %p1601_p12 }
  0x41   :  { %p1604_p1 = pnand %p1603_p0, %p1597_p11 }
  0x43   :  { %1607 = shalt.err (!%p1604_p1)
}
  0x44   :  { %90 = dma.hbm_to_vmem [thread:$0]  %s2049_s7, 512, %s85_s28, [#allocation9], %s1681_s16, %s1681_s16, %s1682_s17  }
  0x45   :  { %s1616_s4 = scalar_lea.vmem %s111_s2, 512  ;;  %p1621_p3 = scmp.lt.s32.totalorder %s111_s2, %s111_s2 }
  0x46   :  { %p1617_p2 = scmp.ne.s32.totalorder %s111_s2, %s1616_s4  ;;  %p1622_p4 = scmp.lt.s32.totalorder %s1616_s4, %s1616_s4 }
  0x48   :  { %p1623_p5 = por %p1622_p4, %p1621_p3 }
  0x4a   :  { %p1624_p6 = pnand %p1623_p5, %p1617_p2 }
  0x4c   :  { %1627 = shalt.err (!%p1624_p6)
}
  0x4d   :  { %116 = dma.hbm_to_vmem [thread:$0]  %s2052_s10, 512, %s111_s2, [#allocation12], %s1681_s16, %s1681_s16, %s1682_s17  }
  0x4e   :  { %s1691_s5 = smov [#allocation14]  }
  0x4f   :  { %s122_s20 = sshll.u32 %s1691_s5, 4  ;;  %s123_s20 = int_to_ptr.vmem [resolvable:$true] %s122_s20 }
  0x50   :  { %s1636_s21 = scalar_lea.vmem %s123_s20, 256  ;;  %p1641_p8 = scmp.lt.s32.totalorder %s123_s20, %s123_s20 }
  0x51   :  { %p1637_p7 = scmp.ne.s32.totalorder %s123_s20, %s1636_s21  ;;  %p1642_p9 = scmp.lt.s32.totalorder %s1636_s21, %s1636_s21 }
  0x53   :  { %p1643_p10 = por %p1642_p9, %p1641_p8 }
  0x55   :  { %p1644_p11 = pnand %p1643_p10, %p1637_p7 }
  0x57   :  { %1647 = shalt.err (!%p1644_p11)
}
  0x58   :  { %128 = dma.hbm_to_vmem [thread:$0]  %s2053_s11, 256, %s123_s20, [#allocation15], %s1685_s25, %s1685_s25, %s1686_s26  }
  0x59   :  { %1668 = dma.done.wait [#allocation3], 256  }
  0x5a   :  { %1669 = vsyncadd [#allocation3], 4294967040 }
  0x5b   :  { %1670 = dma.done.wait [#allocation6], 640  }
  0x5c   :  { %1671 = vsyncadd [#allocation6], 4294966656 }
  0x5d   :  { %1672 = dma.done.wait [#allocation9], 768  }
  0x5e   :  { %1673 = vsyncadd [#allocation9], 4294966528 }
  0x5f   :  { %1674 = dma.done.wait [#allocation12], 768  }
  0x60   :  { %1675 = vsyncadd [#allocation12], 4294966528 }
  0x61   :  { %1676 = dma.done.wait [#allocation15], 256  }
  0x62   :  { %1677 = vsyncadd [#allocation15], 4294967040  ;;  %v1692_v0 = vmov 0   ;;  %v1693_v1 = vmov 0.0   ;;  %vm1694_vm0 = vmmov 0   ;;  %v478_v2 = vld [vmem:[%s2042_s0] sm:$0xff]  ;;  %v165_v8 = vlaneseq }
  0x63   :  { %1431 = vset.pattern.permute.xlu0 %v1692_v0  ;;  %1337 = vmatprep.subr.bf16.mxu0 %v1693_v1  ;;  %v1433_v3 = vld [vmem:[#allocation5] sm:$0xff]   ;;  %v158_v4 = vld [vmem:[#allocation2] sm:$0xff]  ;;  %v159_v5 = vld [vmem:[#allocation2 + $0x8] sm:$0xff]  ;;  %vm175_vm1 = vcmask 130048   ;;  %vm220_vm2 = vcmask 261120   ;;  %vm1237_vm3 = vcmask 781312  }
  0x64   :  { %1339 = vmatprep.mubr.msk.bf16.mxu0 %vm1694_vm0, %v1693_v1  ;;  %1343 = vmatprep.subr.bf16.mxu1 %v1693_v1  ;;  %v164_v6 = vpack.c.bf16 %v159_v5, %v158_v4  ;;  %v479_v7 = vld [vmem:[%s2042_s0 + $0x8] sm:$0xff]  ;;  %v1834_v9 = vshrl.u32 %v165_v8, 7  ;;  %v1839_v11 = vld [vmem:[#allocation11] sm:$0xff]  ;;  %v1270_v12 = vld [vmem:[%s2048_s6] ss:$0 sm:$0xff]  ;;  %s1695_s22 = smov [#allocation16]  }
  0x65   :  { %1347 = vmatprep.mubr.msk.bf16.mxu1 %vm1694_vm0, %v1693_v1  ;;  %1432 = vset.pattern.permute.xlu1 %v1692_v0  ;;  %v1847_v21 = vld [vmem:[#allocation8] sm:$0xff]  ;;  %v1434_v52 = vld [vmem:[#allocation7 + $0x8] sm:$0xff]   ;;  %s1245_s10 = sshll.u32 %s1695_s22, 4  ;;  %s1246_s10 = int_to_ptr.vmem [resolvable:$true] %s1245_s10 }
  0x66   :  { %485 = vperm.xlu0 %1431, %v478_v2   ;;  %1338 = vmatpush3.bf16.msra.mxu0 %v1433_v3  ;;  %v1837_v10 = vsub.s32 0, %v1834_v9  ;;  %v1435_v53 = vld [vmem:[#allocation7] sm:$0xff]   ;;  %v1861_v2 = vsub.s32 1, %v1834_v9  ;;  %v1866_v5 = vsub.s32 2, %v1834_v9  ;;  %s1648_s11 = scalar_lea.vmem %s1246_s10, 128  ;;  %p1653_p13 = scmp.lt.s32.totalorder %s1246_s10, %s1246_s10 }
  0x67   :  { %1351 = vmatprep.subr.bf16.mxu0 %v1693_v1  ;;  %1344 = vmatpush3.bf16.msra.mxu1 %v1434_v52  ;;  %p1649_p12 = scmp.ne.s32.totalorder %s1246_s10, %s1648_s11  ;;  %p1654_p0 = scmp.lt.s32.totalorder %s1648_s11, %s1648_s11 }
  0x68   :  { %v504_v13 = vrot.slane %v1839_v11, %v1837_v10  ;;  %v168_v22 = vrot.slane %v1847_v21, %v1837_v10  ;;  %1345 = vmatprep.subr.bf16.mxu1 %v1693_v1  ;;  %v251_v4 = vrot.slane %v1847_v21, %v1861_v2 }
  0x69   :  { %1340 = vmatmul.mubr.msk.bf16.vlgmr.msra.gmra.mxu0 %vm175_vm1, %v164_v6  ;;  %p1655_p1 = por %p1654_p0, %p1653_p13 }
  0x6a   :  { %490 = vperm.xlu0 %1431, %v479_v7   ;;  %1355 = vmatprep.mubr.msk.bf16.mxu0 %vm1694_vm0, %v1693_v1 }
  0x6b   :  { %1346 = vmatpush3.bf16.msra.mxu1 %v1435_v53  ;;  %p1656_p2 = pnand %p1655_p1, %p1649_p12 }
  0x6c   :  { %1359 = vmatprep.subr.bf16.mxu1 %v1693_v1 }
  0xe1   :  { %v486_v14 = vpop.permute.xlu0 %485 }
  0xe2   :  { %v499_v15 = vmul.f32 %v1270_v12, %v486_v14 }
  0xe4   :  { %v505_v16 = vadd.f32 %v504_v13, %v499_v15 }
  0xe5   :  { %v491_v17 = vpop.permute.xlu0 %490 }
  0xe6   :  { %v507_v18 = vsel %vm220_vm2, %v505_v16, 0.0  ;;  %v500_v19 = vmul.f32 %v1270_v12, %v491_v17  ;;  %v257_v12 = vrot.slane %v1847_v21, %v1866_v5  ;;  %v536_v17 = vrot.slane %v1839_v11, %v1861_v2 }
  0xe7   :  { %508 = vadd.xlane.f32.xlu0 %v507_v18 }
  0xe8   :  { %v506_v20 = vadd.f32 %v504_v13, %v500_v19 }
  0xea   :  { %v510_v31 = vsel %vm220_vm2, %v506_v20, 0.0 }
 0x129   :  { %v213_v23 = vpop.f32.mrf.mxu0 }
 0x12a   :  { %v214_v24 = vadd.f32 %v213_v23, %v168_v22 }
 0x12b   :  { %v1341_v25 = vpop.f32.mrf.mxu0 }
 0x12c   :  { %v221_v26 = vsel %vm220_vm2, %v214_v24, 0.0  ;;  %v542_v25 = vrot.slane %v1839_v11, %v1866_v5 }
 0x12d   :  { %222 = vadd.xlane.f32.xlu1 %v221_v26  ;;  %v216_v27 = vpop.f32.mrf.mxu0 }
 0x12e   :  { %v217_v28 = vadd.f32 %v216_v27, %v168_v22  ;;  %v1436_v27 = vld [vmem:[#allocation10 + $0x8] sm:$0xff]  }
 0x12f   :  { %v1342_v29 = vpop.f32.mrf.mxu0 }
 0x130   :  { %v224_v30 = vsel %vm220_vm2, %v217_v28, 0.0 }
 0x131   :  { %225 = vadd.xlane.f32.xlu1 %v224_v30 }
 0x135   :  { %511 = vadd.xlane.f32.xlu1 %v510_v31 }
 0x170   :  { %v509_v32 = vpop.xlane.xlu0 %508 }
 0x171   :  { %v513_v35 = vmul.f32 0.03125, %v509_v32  ;;  %v1437_v32 = vld [vmem:[#allocation10] sm:$0xff]  }
 0x173   :  { %v515_v40 = vsub.f32 %v505_v16, %v513_v35 }
 0x175   :  { %v517_v48 = vmul.f32 %v515_v40, %v515_v40 }
 0x177   :  { %v519_v49 = vsel %vm220_vm2, %v517_v48, 0.0 }
 0x1b6   :  { %v223_v33 = vpop.xlane.xlu1 %222 }
 0x1b7   :  { %v228_v34 = vmul.f32 0.03125, %v223_v33 }
 0x1b9   :  { %v230_v36 = vsub.f32 %v214_v24, %v228_v34 }
 0x1ba   :  { %v226_v37 = vpop.xlane.xlu1 %225 }
 0x1bb   :  { %v229_v38 = vmul.f32 0.03125, %v226_v37  ;;  %v232_v39 = vmul.f32 %v230_v36, %v230_v36  ;;  %v1883_v37 = vsub.s32 3, %v1834_v9 }
 0x1bd   :  { %v231_v41 = vsub.f32 %v217_v28, %v229_v38  ;;  %v234_v42 = vsel %vm220_vm2, %v232_v39, 0.0  ;;  %v270_v38 = vrot.slane %v1847_v21, %v1883_v37 }
 0x1be   :  { %235 = vadd.xlane.f32.xlu1 %v234_v42  ;;  %v512_v43 = vpop.xlane.xlu1 %511 }
 0x1bf   :  { %v514_v44 = vmul.f32 0.03125, %v512_v43  ;;  %v233_v45 = vmul.f32 %v231_v41, %v231_v41 }
 0x1c1   :  { %v516_v46 = vsub.f32 %v506_v20, %v514_v44  ;;  %v237_v47 = vsel %vm220_vm2, %v233_v45, 0.0  ;;  %v555_v45 = vrot.slane %v1839_v11, %v1883_v37 }
 0x1c2   :  { %238 = vadd.xlane.f32.xlu1 %v237_v47 }
 0x1c3   :  { %v518_v50 = vmul.f32 %v516_v46, %v516_v46 }
 0x1c5   :  { %v522_v51 = vsel %vm220_vm2, %v518_v50, 0.0 }
 0x1c6   :  { %520 = vadd.xlane.f32.xlu1 %v519_v49 }
 0x1ca   :  { %523 = vadd.xlane.f32.xlu1 %v522_v51 }
 0x247   :  { %v236_v54 = vpop.xlane.xlu1 %235 }
 0x248   :  { %v240_v55 = vmul.f32 0.03125, %v236_v54 }
 0x24a   :  { %v242_v56 = vadd.f32 1e-05, %v240_v55 }
 0x24b   :  { %v239_v57 = vpop.xlane.xlu1 %238 }
 0x24c   :  { %1452 = vrsqrt.f32 %v242_v56  ;;  %v241_v58 = vmul.f32 0.03125, %v239_v57 }
 0x24e   :  { %v243_v59 = vadd.f32 1e-05, %v241_v58 }
 0x24f   :  { %v521_v60 = vpop.xlane.xlu1 %520 }
 0x250   :  { %1454 = vrsqrt.f32 %v243_v59  ;;  %v525_v61 = vmul.f32 0.03125, %v521_v60 }
 0x252   :  { %v527_v62 = vadd.f32 1e-05, %v525_v61 }
 0x253   :  { %v524_v63 = vpop.xlane.xlu1 %523 }
 0x254   :  { %1456 = vrsqrt.f32 %v527_v62  ;;  %v526_v0 = vmul.f32 0.03125, %v524_v63 }
 0x256   :  { %v528_v3 = vadd.f32 1e-05, %v526_v0 }
 0x258   :  { %1458 = vrsqrt.f32 %v528_v3 }
 0x259   :  { %v1453_v6 = vpop.eup %1452 }
 0x25a   :  { %v246_v7 = vmul.f32 %v1453_v6, %v230_v36 }
 0x25c   :  { %v252_v8 = vmul.f32 %v251_v4, %v246_v7 }
 0x25d   :  { %v1455_v13 = vpop.eup %1454 }
 0x25e   :  { %v247_v14 = vmul.f32 %v1455_v13, %v231_v41  ;;  %v258_v16 = vadd.f32 %v257_v12, %v252_v8 }
 0x260   :  { %v253_v15 = vmul.f32 %v251_v4, %v247_v14  ;;  %v260_v22 = vmax.f32 %v258_v16, 0.0 }
 0x261   :  { %v1457_v18 = vpop.eup %1456 }
 0x262   :  { %v531_v19 = vmul.f32 %v1457_v18, %v515_v40  ;;  %v259_v20 = vadd.f32 %v257_v12, %v253_v15  ;;  %v877_v18 = vld [vmem:[%s2043_s1 + $0x8] sm:$0xff] }
 0x264   :  { %v261_v23 = vmax.f32 %v259_v20, 0.0  ;;  %v537_v24 = vmul.f32 %v536_v17, %v531_v19  ;;  %v1438_v19 = vld [vmem:[#allocation7 + $0x18] sm:$0xff]   ;;  %v1439_v20 = vld [vmem:[#allocation7 + $0x10] sm:$0xff]  }
 0x265   :  { %v1459_v26 = vpop.eup %1458  ;;  %1352 = vmatpush3.bf16.msra.mxu0 %v1438_v19 }
 0x266   :  { %v532_v28 = vmul.f32 %v1459_v26, %v516_v46  ;;  %v262_v29 = vpack.c.bf16 %v261_v23, %v260_v22  ;;  %v543_v31 = vadd.f32 %v542_v25, %v537_v24  ;;  %1353 = vmatprep.subr.bf16.mxu0 %v1693_v1  ;;  %v876_v22 = vld [vmem:[%s2043_s1] sm:$0xff] }
 0x268   :  { %1348 = vmatmul.mubr.msk.bf16.vlgmr.msra.gmra.mxu1 %vm220_vm2, %v262_v29  ;;  %v538_v30 = vmul.f32 %v536_v17, %v532_v28  ;;  %v545_v34 = vmax.f32 %v543_v31, 0.0 }
 0x269   :  { %1360 = vmatpush3.bf16.msra.mxu1 %v1436_v27  ;;  %1363 = vmatprep.mubr.msk.bf16.mxu1 %vm1694_vm0, %v1693_v1 }
 0x26a   :  { %1361 = vmatprep.subr.bf16.mxu1 %v1693_v1  ;;  %v544_v33 = vadd.f32 %v542_v25, %v538_v30  ;;  %1354 = vmatpush3.bf16.msra.mxu0 %v1439_v20 }
 0x26b   :  { %1367 = vmatprep.subr.bf16.mxu0 %v1693_v1 }
 0x26c   :  { %v546_v35 = vmax.f32 %v544_v33, 0.0 }
 0x26d   :  { %1362 = vmatpush3.bf16.msra.mxu1 %v1437_v32 }
 0x26e   :  { %v547_v36 = vpack.c.bf16 %v546_v35, %v545_v34  ;;  %1375 = vmatprep.subr.bf16.mxu1 %v1693_v1  ;;  %v1906_v34 = vsub.s32 4, %v1834_v9 }
 0x270   :  { %1364 = vmatmul.mubr.msk.bf16.vlgmr.msra.gmra.mxu1 %vm220_vm2, %v547_v36  ;;  %v356_v36 = vrot.slane %v1847_v21, %v1906_v34 }
 0x271   :  { %1379 = vmatprep.mubr.msk.bf16.mxu1 %vm1694_vm0, %v1693_v1 }
 0x328   :  { %v320_v39 = vpop.f32.mrf.mxu1 }
 0x329   :  { %v321_v40 = vadd.f32 %v320_v39, %v270_v38 }
 0x32a   :  { %v1349_v41 = vpop.f32.mrf.mxu1 }
 0x32b   :  { %v327_v42 = vsel %vm220_vm2, %v321_v40, 0.0 }
 0x32c   :  { %328 = vadd.xlane.f32.xlu1 %v327_v42  ;;  %v323_v43 = vpop.f32.mrf.mxu1 }
 0x32d   :  { %v324_v44 = vadd.f32 %v323_v43, %v270_v38  ;;  %v1911_v38 = vsub.s32 5, %v1834_v9 }
 0x32e   :  { %v1350_v46 = vpop.f32.mrf.mxu1 }
 0x32f   :  { %v330_v47 = vsel %vm220_vm2, %v324_v44, 0.0  ;;  %v362_v42 = vrot.slane %v1847_v21, %v1911_v38 }
 0x330   :  { %331 = vadd.xlane.f32.xlu1 %v330_v47  ;;  %v605_v48 = vpop.f32.mrf.mxu1  ;;  %v641_v47 = vrot.slane %v1839_v11, %v1906_v34 }
 0x331   :  { %v606_v49 = vadd.f32 %v605_v48, %v555_v45 }
 0x332   :  { %v1365_v50 = vpop.f32.mrf.mxu1 }
 0x333   :  { %v612_v51 = vsel %vm220_vm2, %v606_v49, 0.0 }
 0x334   :  { %613 = vadd.xlane.f32.xlu1 %v612_v51  ;;  %v608_v52 = vpop.f32.mrf.mxu1 }
 0x335   :  { %v609_v53 = vadd.f32 %v608_v52, %v555_v45 }
 0x336   :  { %v1366_v54 = vpop.f32.mrf.mxu1 }
 0x337   :  { %v615_v55 = vsel %vm220_vm2, %v609_v53, 0.0  ;;  %v647_v54 = vrot.slane %v1839_v11, %v1911_v38 }
 0x338   :  { %616 = vadd.xlane.f32.xlu0 %v615_v55 }
 0x3b5   :  { %v329_v56 = vpop.xlane.xlu1 %328 }
 0x3b6   :  { %v333_v57 = vmul.f32 0.03125, %v329_v56  ;;  %v1440_v56 = vld [vmem:[#allocation10 + $0x18] sm:$0xff]  }
 0x3b8   :  { %v335_v58 = vsub.f32 %v321_v40, %v333_v57 }
 0x3b9   :  { %v332_v59 = vpop.xlane.xlu1 %331 }
 0x3ba   :  { %v334_v60 = vmul.f32 0.03125, %v332_v59  ;;  %v337_v61 = vmul.f32 %v335_v58, %v335_v58 }
 0x3bc   :  { %v336_v62 = vsub.f32 %v324_v44, %v334_v60  ;;  %v339_v63 = vsel %vm220_vm2, %v337_v61, 0.0  ;;  %v1441_v61 = vld [vmem:[#allocation10 + $0x10] sm:$0xff]  }
 0x3bd   :  { %340 = vadd.xlane.f32.xlu1 %v339_v63  ;;  %v614_v0 = vpop.xlane.xlu1 %613 }
 0x3be   :  { %v618_v3 = vmul.f32 0.03125, %v614_v0  ;;  %v338_v4 = vmul.f32 %v336_v62, %v336_v62 }
 0x3c0   :  { %v620_v6 = vsub.f32 %v606_v49, %v618_v3  ;;  %v342_v7 = vsel %vm220_vm2, %v338_v4, 0.0 }
 0x3c1   :  { %v617_v8 = vpop.xlane.xlu0 %616  ;;  %343 = vadd.xlane.f32.xlu0 %v342_v7 }
 0x3c2   :  { %v619_v12 = vmul.f32 0.03125, %v617_v8  ;;  %v622_v13 = vmul.f32 %v620_v6, %v620_v6  ;;  %v1928_v8 = vsub.s32 6, %v1834_v9 }
 0x3c4   :  { %v621_v14 = vsub.f32 %v609_v53, %v619_v12  ;;  %v624_v15 = vsel %vm220_vm2, %v622_v13, 0.0  ;;  %v1288_v12 = vld [vmem:[%s2051_s9] ss:$0 sm:$0xff] }
 0x3c5   :  { %625 = vadd.xlane.f32.xlu1 %v624_v15  ;;  %v661_v15 = vrot.slane %v1839_v11, %v1928_v8 }
 0x3c6   :  { %v623_v16 = vmul.f32 %v621_v14, %v621_v14 }
 0x3c8   :  { %v627_v17 = vsel %vm220_vm2, %v623_v16, 0.0 }
 0x3c9   :  { %628 = vadd.xlane.f32.xlu0 %v627_v17 }
 0x3d6   :  { %883 = vperm.xlu1 %1432, %v876_v22  }
 0x3df   :  { %888 = vperm.xlu0 %1431, %v877_v18  }
 0x446   :  { %v341_v23 = vpop.xlane.xlu1 %340 }
 0x447   :  { %v345_v24 = vmul.f32 0.03125, %v341_v23 }
 0x449   :  { %v347_v25 = vadd.f32 1e-05, %v345_v24 }
 0x44a   :  { %v344_v26 = vpop.xlane.xlu0 %343 }
 0x44b   :  { %1460 = vrsqrt.f32 %v347_v25  ;;  %v346_v27 = vmul.f32 0.03125, %v344_v26 }
 0x44d   :  { %v348_v28 = vadd.f32 1e-05, %v346_v27 }
 0x44e   :  { %v626_v29 = vpop.xlane.xlu1 %625 }
 0x44f   :  { %1462 = vrsqrt.f32 %v348_v28  ;;  %v630_v30 = vmul.f32 0.03125, %v626_v29 }
 0x451   :  { %v632_v31 = vadd.f32 1e-05, %v630_v30 }
 0x452   :  { %v629_v32 = vpop.xlane.xlu0 %628  ;;  %v884_v7 = vpop.permute.xlu1 %883 }
 0x453   :  { %1464 = vrsqrt.f32 %v632_v31  ;;  %v631_v33 = vmul.f32 0.03125, %v629_v32  ;;  %v897_v16 = vmul.f32 %v1288_v12, %v884_v7 }
 0x455   :  { %v633_v35 = vadd.f32 1e-05, %v631_v33 }
 0x457   :  { %1466 = vrsqrt.f32 %v633_v35 }
 0x458   :  { %v1461_v39 = vpop.eup %1460 }
 0x459   :  { %v351_v40 = vmul.f32 %v1461_v39, %v335_v58 }
 0x45a   :  { %v889_v19 = vpop.permute.xlu0 %888 }
 0x45b   :  { %v357_v41 = vmul.f32 %v356_v36, %v351_v40  ;;  %v898_v25 = vmul.f32 %v1288_v12, %v889_v19  ;;  %v1966_v19 = vsub.s32 7, %v1834_v9 }
 0x45c   :  { %v1463_v43 = vpop.eup %1462 }
 0x45d   :  { %v352_v44 = vmul.f32 %v1463_v43, %v336_v62  ;;  %v363_v46 = vadd.f32 %v362_v42, %v357_v41 }
 0x45f   :  { %v358_v45 = vmul.f32 %v356_v36, %v352_v44  ;;  %v365_v51 = vmax.f32 %v363_v46, 0.0  ;;  %v376_v44 = vrot.slane %v1847_v21, %v1928_v8 }
 0x460   :  { %v1465_v48 = vpop.eup %1464 }
 0x461   :  { %v636_v49 = vmul.f32 %v1465_v48, %v620_v6  ;;  %v364_v50 = vadd.f32 %v362_v42, %v358_v45 }
 0x463   :  { %v366_v52 = vmax.f32 %v364_v50, 0.0  ;;  %v642_v53 = vmul.f32 %v641_v47, %v636_v49 }
 0x464   :  { %v1467_v55 = vpop.eup %1466 }
 0x465   :  { %v637_v57 = vmul.f32 %v1467_v55, %v621_v14  ;;  %v367_v58 = vpack.c.bf16 %v366_v52, %v365_v51  ;;  %v648_v60 = vadd.f32 %v647_v54, %v642_v53  ;;  %v1933_v14 = vld [vmem:[#allocation14] sm:$0xff] }
 0x466   :  { %v902_v18 = vrot.slane %v1933_v14, %v1837_v10 }
 0x467   :  { %1356 = vmatmul.mubr.msk.bf16.vlgmr.msra.gmra.mxu0 %vm220_vm2, %v367_v58  ;;  %v643_v59 = vmul.f32 %v641_v47, %v637_v57  ;;  %v650_v63 = vmax.f32 %v648_v60, 0.0 }
 0x468   :  { %1368 = vmatpush3.bf16.msra.mxu0 %v1440_v56  ;;  %1371 = vmatprep.mubr.msk.bf16.mxu0 %vm1694_vm0, %v1693_v1  ;;  %v903_v23 = vadd.f32 %v902_v18, %v897_v16  ;;  %v904_v32 = vadd.f32 %v902_v18, %v898_v25 }
 0x469   :  { %1369 = vmatprep.subr.bf16.mxu0 %v1693_v1  ;;  %v649_v62 = vadd.f32 %v647_v54, %v643_v59 }
 0x46a   :  { %v905_v29 = vsel %vm220_vm2, %v903_v23, 0.0  ;;  %v908_v10 = vsel %vm220_vm2, %v904_v32, 0.0 }
 0x46b   :  { %v651_v0 = vmax.f32 %v649_v62, 0.0  ;;  %v1443_v62 = vld [vmem:[%s2054_s12 + $0x10] sm:$0xff]  }
 0x46c   :  { %1370 = vmatpush3.bf16.msra.mxu0 %v1441_v61  ;;  %v1442_v61 = vld [vmem:[%s2054_s12 + $0x18] sm:$0xff]  }
 0x46d   :  { %v652_v3 = vpack.c.bf16 %v651_v0, %v650_v63  ;;  %1383 = vmatprep.subr.bf16.mxu0 %v1693_v1  ;;  %1376 = vmatpush3.bf16.msra.mxu1 %v1442_v61 }
 0x46e   :  { %1377 = vmatprep.subr.bf16.mxu1 %v1693_v1 }
 0x46f   :  { %1372 = vmatmul.mubr.msk.bf16.vlgmr.msra.gmra.mxu0 %vm220_vm2, %v652_v3 }
 0x470   :  { %1387 = vmatprep.mubr.msk.bf16.mxu0 %vm1694_vm0, %v1693_v1 }
 0x471   :  { %1378 = vmatpush3.bf16.msra.mxu1 %v1443_v62 }
 0x472   :  { %1391 = vmatprep.subr.bf16.mxu1 %v1693_v1 }
 0x527   :  { %v426_v4 = vpop.f32.mrf.mxu0 }
 0x528   :  { %v1946_v52 = vadd.f32 %v426_v4, %v376_v44 }
 0x529   :  { %v1357_v6 = vpop.f32.mrf.mxu0 }
 0x52a   :  { %v433_v58 = vsel %vm220_vm2, %v1946_v52, 0.0 }
 0x52b   :  { %v429_v13 = vpop.f32.mrf.mxu0 }
 0x52c   :  { %v1950_v57 = vadd.f32 %v429_v13, %v376_v44 }
 0x52d   :  { %v1358_v17 = vpop.f32.mrf.mxu0 }
 0x52e   :  { %v436_v60 = vsel %vm220_vm2, %v1950_v57, 0.0 }
 0x52f   :  { %v711_v20 = vpop.f32.mrf.mxu0 }
 0x530   :  { %v712_v22 = vadd.f32 %v711_v20, %v661_v15 }
 0x531   :  { %v1373_v24 = vpop.f32.mrf.mxu0 }
 0x532   :  { %v718_v26 = vsel %vm220_vm2, %v712_v22, 0.0 }
 0x533   :  { %719 = vadd.xlane.f32.xlu1 %v718_v26  ;;  %v714_v27 = vpop.f32.mrf.mxu0 }
 0x534   :  { %v715_v28 = vadd.f32 %v714_v27, %v661_v15  ;;  %v1277_v27 = vld [vmem:[#allocation11 + $0x8] ss:$0 sm:$0xff] }
 0x535   :  { %v1374_v30 = vpop.f32.mrf.mxu0 }
 0x536   :  { %v721_v31 = vsel %vm220_vm2, %v715_v28, 0.0 }
 0x537   :  { %906 = vadd.xlane.f32.xlu1 %v905_v29  ;;  %722 = vadd.xlane.f32.xlu0 %v721_v31 }
 0x53b   :  { %909 = vadd.xlane.f32.xlu0 %v908_v10  ;;  %v934_v10 = vrot.slane %v1933_v14, %v1861_v2 }
 0x5bc   :  { %v720_v33 = vpop.xlane.xlu1 %719 }
 0x5bd   :  { %v724_v35 = vmul.f32 0.03125, %v720_v33 }
 0x5bf   :  { %v726_v36 = vsub.f32 %v712_v22, %v724_v35  ;;  %v747_v22 = vrot.slane %v1839_v11, %v1966_v19  ;;  %v940_v11 = vrot.slane %v1933_v14, %v1866_v5 }
 0x5c0   :  { %v907_v39 = vpop.xlane.xlu1 %906  ;;  %v723_v40 = vpop.xlane.xlu0 %722 }
 0x5c1   :  { %v911_v41 = vmul.f32 0.03125, %v907_v39  ;;  %v725_v42 = vmul.f32 0.03125, %v723_v40  ;;  %v728_v43 = vmul.f32 %v726_v36, %v726_v36 }
 0x5c3   :  { %v913_v45 = vsub.f32 %v903_v23, %v911_v41  ;;  %v727_v46 = vsub.f32 %v715_v28, %v725_v42  ;;  %v730_v47 = vsel %vm220_vm2, %v728_v43, 0.0 }
 0x5c4   :  { %731 = vadd.xlane.f32.xlu1 %v730_v47  ;;  %v910_v48 = vpop.xlane.xlu0 %909 }
 0x5c5   :  { %v912_v49 = vmul.f32 0.03125, %v910_v48  ;;  %v915_v50 = vmul.f32 %v913_v45, %v913_v45  ;;  %v729_v51 = vmul.f32 %v727_v46, %v727_v46 }
 0x5c7   :  { %v914_v53 = vsub.f32 %v904_v32, %v912_v49  ;;  %v917_v54 = vsel %vm220_vm2, %v915_v50, 0.0  ;;  %v733_v55 = vsel %vm220_vm2, %v729_v51, 0.0 }
 0x5c8   :  { %918 = vadd.xlane.f32.xlu1 %v917_v54  ;;  %734 = vadd.xlane.f32.xlu0 %v733_v55  ;;  %v953_v54 = vrot.slane %v1933_v14, %v1883_v37 }
 0x5c9   :  { %v916_v56 = vmul.f32 %v914_v53, %v914_v53 }
 0x5cb   :  { %v920_v59 = vsel %vm220_vm2, %v916_v56, 0.0 }
 0x5cc   :  { %434 = vadd.xlane.f32.xlu1 %v433_v58  ;;  %921 = vadd.xlane.f32.xlu0 %v920_v59 }
 0x5d0   :  { %437 = vadd.xlane.f32.xlu0 %v436_v60 }
 0x64d   :  { %v732_v63 = vpop.xlane.xlu1 %731 }
 0x64e   :  { %v736_v0 = vmul.f32 0.03125, %v732_v63 }
 0x650   :  { %v738_v3 = vadd.f32 1e-05, %v736_v0 }
 0x651   :  { %v919_v4 = vpop.xlane.xlu1 %918  ;;  %v735_v6 = vpop.xlane.xlu0 %734 }
 0x652   :  { %1468 = vrsqrt.f32 %v738_v3  ;;  %v923_v7 = vmul.f32 0.03125, %v919_v4  ;;  %v737_v12 = vmul.f32 0.03125, %v735_v6 }
 0x654   :  { %v925_v13 = vadd.f32 1e-05, %v923_v7  ;;  %v739_v15 = vadd.f32 1e-05, %v737_v12 }
 0x655   :  { %v922_v16 = vpop.xlane.xlu0 %921  ;;  %v435_v5 = vpop.xlane.xlu1 %434 }
 0x656   :  { %1470 = vrsqrt.f32 %v925_v13  ;;  %v924_v17 = vmul.f32 0.03125, %v922_v16  ;;  %v439_v50 = vmul.f32 0.03125, %v435_v5  ;;  %v1447_v13 = vld [vmem:[%s2054_s12] sm:$0xff]  }
 0x657   :  { %1472 = vrsqrt.f32 %v739_v15 }
 0x658   :  { %v926_v18 = vadd.f32 1e-05, %v924_v17  ;;  %v441_v56 = vsub.f32 %v1946_v52, %v439_v50 }
 0x659   :  { %v438_v51 = vpop.xlane.xlu0 %437 }
 0x65a   :  { %1474 = vrsqrt.f32 %v926_v18  ;;  %v440_v58 = vmul.f32 0.03125, %v438_v51  ;;  %v443_v0 = vmul.f32 %v441_v56, %v441_v56 }
 0x65c   :  { %v442_v62 = vsub.f32 %v1950_v57, %v440_v58  ;;  %v445_v7 = vsel %vm220_vm2, %v443_v0, 0.0  ;;  %v1446_v57 = vld [vmem:[%s2054_s12 + $0x8] sm:$0xff]  }
 0x65d   :  { %1384 = vmatpush3.bf16.msra.mxu0 %v1446_v57 }
 0x65e   :  { %v444_v12 = vmul.f32 %v442_v62, %v442_v62  ;;  %1385 = vmatprep.subr.bf16.mxu0 %v1693_v1 }
 0x65f   :  { %v1469_v20 = vpop.eup %1468 }
 0x660   :  { %v742_v23 = vmul.f32 %v1469_v20, %v726_v36  ;;  %v1444_v36 = vld [vmem:[#allocation13 + $0x8] sm:$0xff]   ;;  %v448_v52 = vsel %vm220_vm2, %v444_v12, 0.0 }
 0x661   :  { %1386 = vmatpush3.bf16.msra.mxu0 %v1447_v13 }
 0x662   :  { %v748_v25 = vmul.f32 %v747_v22, %v742_v23  ;;  %1399 = vmatprep.subr.bf16.mxu0 %v1693_v1 }
 0x663   :  { %v1471_v24 = vpop.eup %1470 }
 0x664   :  { %v1473_v26 = vpop.eup %1472  ;;  %v929_v30 = vmul.f32 %v1471_v24, %v913_v45  ;;  %v754_v32 = vadd.f32 %v1277_v27, %v748_v25  ;;  %v1445_v45 = vld [vmem:[#allocation13] sm:$0xff]  }
 0x665   :  { %v743_v28 = vmul.f32 %v1473_v26, %v727_v46 }
 0x666   :  { %v756_v39 = vmax.f32 %v754_v32, 0.0  ;;  %v935_v41 = vmul.f32 %v934_v10, %v929_v30 }
 0x667   :  { %v1475_v29 = vpop.eup %1474  ;;  %v749_v31 = vmul.f32 %v747_v22, %v743_v28 }
 0x668   :  { %v930_v33 = vmul.f32 %v1475_v29, %v914_v53  ;;  %v941_v44 = vadd.f32 %v940_v11, %v935_v41 }
 0x669   :  { %v755_v9 = vadd.f32 %v1277_v27, %v749_v31 }
 0x66a   :  { %v936_v35 = vmul.f32 %v934_v10, %v930_v33  ;;  %v943_v46 = vmax.f32 %v941_v44, 0.0  ;;  %v462_v10 = vrot.slane %v1847_v21, %v1966_v19  ;;  %v1449_v21 = vld [vmem:[#allocation13 + $0x10] sm:$0xff]  }
 0x66b   :  { %v757_v40 = vmax.f32 %v755_v9, 0.0 }
 0x66c   :  { %v942_v43 = vadd.f32 %v940_v11, %v936_v35 }
 0x66d   :  { %v758_v42 = vpack.c.bf16 %v757_v40, %v756_v39  ;;  %v1269_v40 = vld [vmem:[#allocation8 + $0x8] ss:$0 sm:$0xff] }
 0x66e   :  { %v944_v2 = vmax.f32 %v942_v43, 0.0 }
 0x66f   :  { %1380 = vmatmul.mubr.msk.bf16.vlgmr.msra.gmra.mxu1 %vm220_vm2, %v758_v42 }
 0x670   :  { %1392 = vmatpush3.bf16.msra.mxu1 %v1444_v36  ;;  %1395 = vmatprep.mubr.msk.bf16.mxu1 %vm1694_vm0, %v1693_v1  ;;  %v945_v47 = vpack.c.bf16 %v944_v2, %v943_v46  ;;  %v1448_v2 = vld [vmem:[#allocation13 + $0x18] sm:$0xff]  }
 0x671   :  { %1393 = vmatprep.subr.bf16.mxu1 %v1693_v1 }
 0x674   :  { %1394 = vmatpush3.bf16.msra.mxu1 %v1445_v45 }
 0x675   :  { %1407 = vmatprep.subr.bf16.mxu1 %v1693_v1 }
 0x677   :  { %1396 = vmatmul.mubr.msk.bf16.vlgmr.msra.gmra.mxu1 %vm220_vm2, %v945_v47 }
 0x678   :  { %1411 = vmatprep.mubr.msk.bf16.mxu1 %vm1694_vm0, %v1693_v1 }
 0x72f   :  { %v1982_v48 = vpop.f32.mrf.mxu1 }
 0x731   :  { %v1381_v49 = vpop.f32.mrf.mxu1 }
 0x733   :  { %v1984_v53 = vpop.f32.mrf.mxu1 }
 0x735   :  { %v1382_v55 = vpop.f32.mrf.mxu1 }
 0x737   :  { %v1003_v59 = vpop.f32.mrf.mxu1 }
 0x738   :  { %v1004_v60 = vadd.f32 %v1003_v59, %v953_v54  ;;  %v1045_v59 = vrot.slane %v1933_v14, %v1911_v38 }
 0x739   :  { %v1397_v61 = vpop.f32.mrf.mxu1 }
 0x73a   :  { %v1010_v63 = vsel %vm220_vm2, %v1004_v60, 0.0 }
 0x73b   :  { %1011 = vadd.xlane.f32.xlu1 %v1010_v63  ;;  %v1006_v3 = vpop.f32.mrf.mxu1 }
 0x73c   :  { %v1007_v4 = vadd.f32 %v1006_v3, %v953_v54  ;;  %v1039_v54 = vrot.slane %v1933_v14, %v1906_v34 }
 0x73d   :  { %v1398_v6 = vpop.f32.mrf.mxu1 }
 0x73e   :  { %v1013_v37 = vsel %vm220_vm2, %v1007_v4, 0.0 }
 0x73f   :  { %446 = vadd.xlane.f32.xlu1 %v445_v7  ;;  %1014 = vadd.xlane.f32.xlu0 %v1013_v37 }
 0x743   :  { %449 = vadd.xlane.f32.xlu0 %v448_v52  ;;  %v1059_v52 = vrot.slane %v1933_v14, %v1928_v8 }
 0x7c4   :  { %v1012_v15 = vpop.xlane.xlu1 %1011 }
 0x7c5   :  { %v1016_v16 = vmul.f32 0.03125, %v1012_v15 }
 0x7c7   :  { %v1018_v17 = vsub.f32 %v1004_v60, %v1016_v16 }
 0x7c8   :  { %v447_v18 = vpop.xlane.xlu1 %446  ;;  %v1015_v20 = vpop.xlane.xlu0 %1014 }
 0x7c9   :  { %v451_v22 = vmul.f32 0.03125, %v447_v18  ;;  %v1017_v23 = vmul.f32 0.03125, %v1015_v20  ;;  %v1020_v24 = vmul.f32 %v1018_v17, %v1018_v17 }
 0x7cb   :  { %v453_v25 = vadd.f32 1e-05, %v451_v22  ;;  %v1019_v26 = vsub.f32 %v1007_v4, %v1017_v23  ;;  %v1022_v27 = vsel %vm220_vm2, %v1020_v24, 0.0 }
 0x7cc   :  { %1023 = vadd.xlane.f32.xlu1 %v1022_v27  ;;  %v450_v28 = vpop.xlane.xlu0 %449 }
 0x7cd   :  { %1476 = vrsqrt.f32 %v453_v25  ;;  %v452_v29 = vmul.f32 0.03125, %v450_v28  ;;  %v1021_v30 = vmul.f32 %v1019_v26, %v1019_v26 }
 0x7cf   :  { %v454_v31 = vadd.f32 1e-05, %v452_v29  ;;  %v1025_v32 = vsel %vm220_vm2, %v1021_v30, 0.0 }
 0x7d0   :  { %1026 = vadd.xlane.f32.xlu0 %v1025_v32  ;;  %v1451_v32 = vld [vmem:[%s2054_s12 + $0x20] sm:$0xff]  }
 0x7d1   :  { %1478 = vrsqrt.f32 %v454_v31  ;;  %v1450_v31 = vld [vmem:[%s2054_s12 + $0x28] sm:$0xff]  }
 0x7d2   :  { %1408 = vmatpush3.bf16.msra.mxu1 %v1450_v31 }
 0x7d3   :  { %1409 = vmatprep.subr.bf16.mxu1 %v1693_v1 }
 0x7d6   :  { %1410 = vmatpush3.bf16.msra.mxu1 %v1451_v32 }
 0x7da   :  { %v1477_v33 = vpop.eup %1476 }
 0x7db   :  { %v457_v9 = vmul.f32 %v1477_v33, %v441_v56 }
 0x7dd   :  { %v463_v35 = vmul.f32 %v462_v10, %v457_v9 }
 0x7de   :  { %v1479_v39 = vpop.eup %1478 }
 0x7df   :  { %v458_v41 = vmul.f32 %v1479_v39, %v442_v62  ;;  %v469_v36 = vadd.f32 %v1269_v40, %v463_v35 }
 0x7e1   :  { %v464_v11 = vmul.f32 %v462_v10, %v458_v41  ;;  %v471_v43 = vmax.f32 %v469_v36, 0.0  ;;  %v1145_v41 = vrot.slane %v1933_v14, %v1966_v19  ;;  %v1303_v14 = vld [vmem:[%s2055_s13] ss:$0 sm:$0xff] }
 0x7e3   :  { %v470_v42 = vadd.f32 %v1269_v40, %v464_v11 }
 0x7e5   :  { %v472_v44 = vmax.f32 %v470_v42, 0.0 }
 0x7e7   :  { %v473_v45 = vpack.c.bf16 %v472_v44, %v471_v43  ;;  %v1295_v44 = vld [vmem:[#allocation14 + $0x8] ss:$0 sm:$0xff] }
 0x7e9   :  { %1388 = vmatmul.mubr.msk.bf16.vlgmr.msra.gmra.mxu0 %vm220_vm2, %v473_v45 }
 0x7ea   :  { %1403 = vmatprep.mubr.msk.bf16.mxu0 %vm1694_vm0, %v1693_v1  ;;  %1400 = vmatpush3.bf16.msra.mxu0 %v1448_v2 }
 0x7eb   :  { %1401 = vmatprep.subr.bf16.mxu0 %v1693_v1 }
 0x7ee   :  { %1402 = vmatpush3.bf16.msra.mxu0 %v1449_v21 }
 0x855   :  { %v1024_v46 = vpop.xlane.xlu1 %1023 }
 0x856   :  { %v1028_v47 = vmul.f32 0.03125, %v1024_v46 }
 0x858   :  { %v1030_v5 = vadd.f32 1e-05, %v1028_v47 }
 0x859   :  { %v1027_v49 = vpop.xlane.xlu0 %1026 }
 0x85a   :  { %1480 = vrsqrt.f32 %v1030_v5  ;;  %v1029_v50 = vmul.f32 0.03125, %v1027_v49 }
 0x85c   :  { %v1031_v51 = vadd.f32 1e-05, %v1029_v50 }
 0x85e   :  { %1482 = vrsqrt.f32 %v1031_v51 }
 0x867   :  { %v1481_v55 = vpop.eup %1480 }
 0x868   :  { %v1034_v56 = vmul.f32 %v1481_v55, %v1018_v17 }
 0x86a   :  { %v1040_v58 = vmul.f32 %v1039_v54, %v1034_v56 }
 0x86b   :  { %v1483_v60 = vpop.eup %1482 }
 0x86c   :  { %v1035_v61 = vmul.f32 %v1483_v60, %v1019_v26  ;;  %v1046_v63 = vadd.f32 %v1045_v59, %v1040_v58 }
 0x86e   :  { %v1041_v62 = vmul.f32 %v1039_v54, %v1035_v61  ;;  %v1048_v3 = vmax.f32 %v1046_v63, 0.0 }
 0x870   :  { %v1047_v0 = vadd.f32 %v1045_v59, %v1041_v62 }
 0x872   :  { %v1049_v4 = vmax.f32 %v1047_v0, 0.0 }
 0x874   :  { %v1050_v6 = vpack.c.bf16 %v1049_v4, %v1048_v3 }
 0x876   :  { %1404 = vmatmul.mubr.msk.bf16.vlgmr.msra.gmra.mxu0 %vm220_vm2, %v1050_v6 }
 0x8a9   :  { %v869_v7 = vpop.f32.mrf.mxu0 }
 0x8aa   :  { %v870_v49 = vadd.f32 %v869_v7, %v1982_v48 }
 0x8ab   :  { %v1389_v37 = vpop.f32.mrf.mxu0 }
 0x8ad   :  { %v872_v12 = vpop.f32.mrf.mxu0 }
 0x8ae   :  { %v873_v54 = vadd.f32 %v872_v12, %v1984_v53 }
 0x8af   :  { %v1390_v34 = vpop.f32.mrf.mxu0 }
 0x936   :  { %v1109_v57 = vpop.f32.mrf.mxu0 }
 0x937   :  { %v1110_v13 = vadd.f32 %v1109_v57, %v1059_v52 }
 0x938   :  { %v1405_v38 = vpop.f32.mrf.mxu0 }
 0x939   :  { %v1116_v15 = vsel %vm220_vm2, %v1110_v13, 0.0 }
 0x93a   :  { %1117 = vadd.xlane.f32.xlu1 %v1116_v15  ;;  %v1112_v16 = vpop.f32.mrf.mxu0 }
 0x93b   :  { %v1113_v17 = vadd.f32 %v1112_v16, %v1059_v52 }
 0x93c   :  { %v1406_v18 = vpop.f32.mrf.mxu0 }
 0x93d   :  { %v1119_v20 = vsel %vm220_vm2, %v1113_v17, 0.0 }
 0x93e   :  { %1120 = vadd.xlane.f32.xlu0 %v1119_v20 }
 0x9c3   :  { %v1118_v22 = vpop.xlane.xlu1 %1117 }
 0x9c4   :  { %v1122_v23 = vmul.f32 0.03125, %v1118_v22 }
 0x9c6   :  { %v1124_v24 = vsub.f32 %v1110_v13, %v1122_v23 }
 0x9c7   :  { %v1121_v25 = vpop.xlane.xlu0 %1120 }
 0x9c8   :  { %v1123_v26 = vmul.f32 0.03125, %v1121_v25  ;;  %v1126_v27 = vmul.f32 %v1124_v24, %v1124_v24 }
 0x9ca   :  { %v1125_v28 = vsub.f32 %v1113_v17, %v1123_v26  ;;  %v1128_v8 = vsel %vm220_vm2, %v1126_v27, 0.0 }
 0x9cb   :  { %1129 = vadd.xlane.f32.xlu1 %v1128_v8 }
 0x9cc   :  { %v1127_v29 = vmul.f32 %v1125_v28, %v1125_v28 }
 0x9ce   :  { %v1131_v30 = vsel %vm220_vm2, %v1127_v29, 0.0 }
 0x9cf   :  { %1132 = vadd.xlane.f32.xlu0 %v1131_v30 }
 0xa54   :  { %v1130_v10 = vpop.xlane.xlu1 %1129 }
 0xa55   :  { %v1134_v33 = vmul.f32 0.03125, %v1130_v10 }
 0xa57   :  { %v1136_v9 = vadd.f32 1e-05, %v1134_v33 }
 0xa58   :  { %v1133_v35 = vpop.xlane.xlu0 %1132 }
 0xa59   :  { %1484 = vrsqrt.f32 %v1136_v9  ;;  %v1135_v39 = vmul.f32 0.03125, %v1133_v35 }
 0xa5b   :  { %v1137_v40 = vadd.f32 1e-05, %v1135_v39 }
 0xa5d   :  { %1486 = vrsqrt.f32 %v1137_v40 }
 0xa66   :  { %v1485_v11 = vpop.eup %1484 }
 0xa67   :  { %v1140_v36 = vmul.f32 %v1485_v11, %v1124_v24 }
 0xa69   :  { %v1146_v42 = vmul.f32 %v1145_v41, %v1140_v36 }
 0xa6a   :  { %v1487_v43 = vpop.eup %1486 }
 0xa6b   :  { %v1141_v45 = vmul.f32 %v1487_v43, %v1125_v28  ;;  %v1152_v1 = vadd.f32 %v1295_v44, %v1146_v42 }
 0xa6d   :  { %v1147_v2 = vmul.f32 %v1145_v41, %v1141_v45  ;;  %v1154_v46 = vmax.f32 %v1152_v1, 0.0 }
 0xa6f   :  { %v1153_v21 = vadd.f32 %v1295_v44, %v1147_v2 }
 0xa71   :  { %v1155_v47 = vmax.f32 %v1153_v21, 0.0 }
 0xa73   :  { %v1156_v5 = vpack.c.bf16 %v1155_v47, %v1154_v46 }
 0xa75   :  { %1412 = vmatmul.mubr.msk.bf16.vlgmr.msra.gmra.mxu1 %vm220_vm2, %v1156_v5 }
 0xb35   :  { %v1211_v50 = vpop.f32.mrf.mxu1 }
 0xb36   :  { %v1218_v19 = vadd.f32 %v1211_v50, %v870_v49 }
 0xb37   :  { %v1413_v51 = vpop.f32.mrf.mxu1 }
 0xb38   :  { %v1227_v55 = vadd.f32 %v1303_v14, %v1218_v19 }
 0xb39   :  { %v1214_v56 = vpop.f32.mrf.mxu1 }
 0xb3a   :  { %v1306_v58 = vpack.c.bf16 %v1227_v55, %v1227_v55  ;;  %v1219_v59 = vadd.f32 %v1214_v56, %v873_v54 }
 0xb3b   :  { %v1414_v60 = vpop.f32.mrf.mxu1 }
 0xb3c   :  { %v1228_v61 = vadd.f32 %v1303_v14, %v1219_v59  ;;  %1238 = vst.msk [vmem:[#allocation16] sm:$0xf] %vm1237_vm3, %v1306_v58 }
 0xb3e   :  { %v1307_v48 = vpack.c.bf16 %v1228_v61, %v1228_v61 }
 0xb40   :  { %1239 = vst.msk [vmem:[#allocation16 + $0x4] sm:$0xf] %vm1237_vm3, %v1307_v48 }
 0xb41   :  { %1659 = shalt.err (!%p1656_p2)
}
 0xb42   :  { %1251 = dma.vmem_to_hbm [thread:$0]  %s1246_s10, 128, %s2056_s14, [#allocation4], %s1681_s16, %s1681_s16, %s1682_s17  }
 0xb43   :  { %1678 = dma.done.wait [#allocation4], 128  }
 0xb44   :  { %1679 = vsyncadd [#allocation4], 4294967168 }
 0xb45   :  { %1255 = vsyncpa [#allocation3], 1 }
 0xb46   :  { %1256 = vsyncpa [#allocation6], 1 }
 0xb47   :  { %1257 = vsyncpa [#allocation9], 1 }
 0xb48   :  { %1258 = vsyncpa [#allocation12], 1 }
 0xb49   :  { %1259 = vsyncpa [#allocation15], 1 }
 0xb4a   :  { %1260 = vsyncpa [#allocation4], 1 }

</bundles_post_ra>
